<compile_context>
chip_gen: v5e
topology: v5e:2x2
jax: 0.10.0
libtpu: 0.0.40
codegen_flags: <defaults>
</compile_context>

<pallas_src>
import functools

import jax
import jax.numpy as jnp
from jax.experimental import pallas as pl
from jax.experimental.pallas import tpu as pltpu

BN_EPS = 0.8           # BatchNorm1d(out_feat, 0.8) -> eps=0.8 (positional-arg quirk; intentional)
LRELU_SLOPE = 0.2
HIDDEN = (128, 256, 256, 512, 256)   # fixed hidden widths of the Generator MLP
LAT_PAD = 128                        # latent lanes padded to one full lane tile
OUT_PAD = 128                        # output lanes padded to one full lane tile


def _round_up(x, m):
    return -(-x // m) * m


def _dot_bf16(x_f32, w_bf16):
    # MXU matmul: bf16 operands, f32 accumulation.
    return jnp.dot(x_f32.astype(jnp.bfloat16), w_bf16,
                   preferred_element_type=jnp.float32)


def _bn_lrelu(y, gamma, beta):
    # PyTorch BatchNorm1d training mode (biased batch stats, eps=0.8) + LeakyReLU(0.2).
    # Single reduction pass: var = E[y^2] - mu^2; scale/shift pre-combined to (1,N).
    mu = jnp.mean(y, axis=0, keepdims=True)
    ey2 = jnp.mean(y * y, axis=0, keepdims=True)
    var = ey2 - mu * mu
    scale = gamma * jax.lax.rsqrt(var + BN_EPS)
    shift = beta - mu * scale
    h = y * scale + shift
    return jnp.where(h > 0, h, LRELU_SLOPE * h)


def generator_kernel(z_ref, mean_w_ref, wa_ref, gb_ref, wb_hbm, wc_hbm,
                     out_ref, wb_vmem, wc_vmem, dma_sem,
                     *, gamma_avg, batch, batch_pad):
    # Kick off the two big weight-slab DMAs immediately so HBM->VMEM traffic
    # overlaps with the mean_w EMA and layer 1 (whose weight, w1, is in wa).
    wb_cp = pltpu.make_async_copy(wb_hbm, wb_vmem, dma_sem.at[0])
    wc_cp = pltpu.make_async_copy(wc_hbm, wc_vmem, dma_sem.at[1])
    wb_cp.start()
    wc_cp.start()

    z = z_ref[...]                               # (B, LAT_PAD) f32, extra lanes zero

    # Fused mean_w EMA:  new = g * old + (1 - g) * z.mean(dim=0, keepdim=True)
    # Written into the extra sublane rows of the single lane-dense output slab.
    zmean = jnp.mean(z, axis=0, keepdims=True)
    new_mean = gamma_avg * mean_w_ref[...] + (1.0 - gamma_avg) * zmean
    row_ids = jax.lax.broadcasted_iota(jnp.int32, (8, OUT_PAD), 0)
    out_ref[batch_pad:batch_pad + 8, :] = jnp.where(
        row_ids == 0, jnp.broadcast_to(new_mean, (8, OUT_PAD)), 0.0)

    # Static, tile-aligned row offsets into the packed weight slabs.
    o3 = HIDDEN[0]                   # w3 starts after w2 rows (128)
    o5 = HIDDEN[0] + HIDDEN[1]       # w5 starts after w2+w3 rows (384)
    e5 = o5 + HIDDEN[3]              # 896

    # 5x [Linear(no bias) -> BN(train) -> LeakyReLU]
    h = _bn_lrelu(_dot_bf16(z, wa_ref[0:LAT_PAD, :]),                # layer 1 (wa resident)
                  gb_ref[0:1, :HIDDEN[0]], gb_ref[5:6, :HIDDEN[0]])
    wb_cp.wait()                                                     # need w2/w3/w5 now
    h = _bn_lrelu(_dot_bf16(h, wb_vmem[0:o3, :]),                    # layer 2
                  gb_ref[1:2, :HIDDEN[1]], gb_ref[6:7, :HIDDEN[1]])
    h = _bn_lrelu(_dot_bf16(h, wb_vmem[o3:o5, :]),                   # layer 3
                  gb_ref[2:3, :HIDDEN[2]], gb_ref[7:8, :HIDDEN[2]])
    wc_cp.wait()                                                     # need w4 now
    h = _bn_lrelu(_dot_bf16(h, wc_vmem[...]),                        # layer 4
                  gb_ref[3:4, :HIDDEN[3]], gb_ref[8:9, :HIDDEN[3]])
    h = _bn_lrelu(_dot_bf16(h, wb_vmem[o5:e5, :]),                   # layer 5
                  gb_ref[4:5, :HIDDEN[4]], gb_ref[9:10, :HIDDEN[4]])

    # Final Linear(256 -> vector_size, cols padded to 128) + bias + tanh.
    y6 = _dot_bf16(h, wa_ref[LAT_PAD:LAT_PAD + HIDDEN[4], :]) \
        + gb_ref[10:11, :OUT_PAD]
    out_ref[0:batch, :] = jnp.tanh(y6)


def init_generator_params(key, latent_dim, vector_size):
    """Deterministic synthetic params mirroring the PyTorch module layout."""
    dims = [latent_dim] + list(HIDDEN) + [vector_size]
    params = {}
    for i in range(6):
        fan_in, fan_out = dims[i], dims[i + 1]
        key, kw, kb = jax.random.split(key, 3)
        bound = 1.0 / jnp.sqrt(float(fan_in))
        params[f"w{i+1}"] = jax.random.uniform(
            kw, (fan_in, fan_out), jnp.float32, -bound, bound)
        params[f"b{i+1}"] = jax.random.uniform(
            kb, (1, fan_out), jnp.float32, -bound, bound)
        if i < 5:   # BN affine params (randomized to make the check non-trivial)
            key, kg, ke = jax.random.split(key, 3)
            params[f"g{i+1}"] = jax.random.uniform(
                kg, (1, fan_out), jnp.float32, 0.5, 1.5)
            params[f"be{i+1}"] = jax.random.uniform(
                ke, (1, fan_out), jnp.float32, -0.5, 0.5)
    return params


def pack_params(params, latent_dim, vector_size):
    """Pack params into a few lane-dense slabs; weights are cast to bf16."""
    assert latent_dim <= LAT_PAD and vector_size <= OUT_PAD and HIDDEN[0] == OUT_PAD

    # wa: [LAT_PAD + 256, 128] = [w1 (zero-padded rows) ; w6 (zero-padded cols)]
    w1_pad = jnp.zeros((LAT_PAD, OUT_PAD), jnp.float32)
    w1_pad = w1_pad.at[:latent_dim, :].set(params["w1"])
    w6_pad = jnp.zeros((HIDDEN[4], OUT_PAD), jnp.float32)
    w6_pad = w6_pad.at[:, :vector_size].set(params["w6"])
    wa = jnp.concatenate([w1_pad, w6_pad], axis=0).astype(jnp.bfloat16)

    # wb: [896, 256] = [w2 ; w3 ; w5]   (all 256 output lanes, no padding waste)
    wb = jnp.concatenate(
        [params["w2"], params["w3"], params["w5"]], axis=0).astype(jnp.bfloat16)

    # wc: [256, 512] = w4
    wc = params["w4"].astype(jnp.bfloat16)

    # gb: [16, 512] f32 — rows 0-4 gammas, 5-9 betas, 10 = b6 (b1..b5 dropped:
    # a bias before training-mode BN cancels exactly).
    gb = jnp.zeros((16, 512), jnp.float32)
    for i in range(5):
        gb = gb.at[i, :HIDDEN[i]].set(params[f"g{i+1}"][0])
        gb = gb.at[5 + i, :HIDDEN[i]].set(params[f"be{i+1}"][0])
    gb = gb.at[10, :vector_size].set(params["b6"][0])

    return {"wa": wa, "wb": wb, "wc": wc, "gb": gb}


@functools.partial(jax.jit, static_argnames=("vector_size", "gamma_avg"))
def generator_forward(z, mean_w, packed, *, vector_size, gamma_avg=0.9):
    B, latent_dim = z.shape
    b_pad = _round_up(B, 8)

    # Zero-pad z / mean_w to a full 128-lane tile (lane-dense, tile-aligned).
    z_pad = jnp.zeros((B, LAT_PAD), jnp.float32).at[:, :latent_dim].set(z)
    mean_pad = jnp.zeros((1, LAT_PAD), jnp.float32).at[:, :latent_dim].set(mean_w)

    kernel = functools.partial(generator_kernel, gamma_avg=float(gamma_avg),
                               batch=B, batch_pad=b_pad)
    vmem = pl.BlockSpec(memory_space=pltpu.MemorySpace.VMEM)
    hbm = pl.BlockSpec(memory_space=pl.ANY)     # big slabs: manual overlapped DMA

    out = pl.pallas_call(
        kernel,
        out_shape=jax.ShapeDtypeStruct((b_pad + 8, OUT_PAD), jnp.float32),
        in_specs=[vmem, vmem, vmem, vmem, hbm, hbm],
        out_specs=vmem,
        scratch_shapes=[
            pltpu.VMEM((HIDDEN[0] + HIDDEN[1] + HIDDEN[3], HIDDEN[1]), jnp.bfloat16),  # wb
            pltpu.VMEM((HIDDEN[2], HIDDEN[3]), jnp.bfloat16),                          # wc
            pltpu.SemaphoreType.DMA((2,)),
        ],
    )(z_pad, mean_pad, packed["wa"], packed["gb"], packed["wb"], packed["wc"])

    img = out[0:B, :vector_size]
    new_mean_w = out[b_pad:b_pad + 1, :latent_dim]
    return img, new_mean_w


# ----------------------------- references ----------------------------------
def _reference_bf16(z, params):
    """Matches kernel numerics: bf16 weights/activations at the matmul, f32 math,
    one-pass BN stats, biases b1..b5 dropped (training-mode BN cancels them)."""
    h = z
    for i in range(1, 6):
        w = params[f"w{i}"].astype(jnp.bfloat16)
        y = jnp.dot(h.astype(jnp.bfloat16), w, preferred_element_type=jnp.float32)
        mu = jnp.mean(y, axis=0, keepdims=True)
        var = jnp.mean(y * y, axis=0, keepdims=True) - mu * mu
        scale = params[f"g{i}"] * jax.lax.rsqrt(var + BN_EPS)
        hb = y * scale + (params[f"be{i}"] - mu * scale)
        h = jnp.where(hb > 0, hb, LRELU_SLOPE * hb)
    w6 = params["w6"].astype(jnp.bfloat16)
    y = jnp.dot(h.astype(jnp.bfloat16), w6,
                preferred_element_type=jnp.float32) + params["b6"]
    return jnp.tanh(y)


def _reference_f32(z, params):
    """Full PyTorch semantics: f32 weights WITH b1..b5 (BN cancels them)."""
    h = z
    for i in range(1, 6):
        y = h @ params[f"w{i}"] + params[f"b{i}"]
        mu = jnp.mean(y, axis=0, keepdims=True)
        var = jnp.mean(jnp.square(y - mu), axis=0, keepdims=True)
        hb = (y - mu) / jnp.sqrt(var + BN_EPS) * params[f"g{i}"] + params[f"be{i}"]
        h = jnp.where(hb > 0, hb, LRELU_SLOPE * hb)
    return jnp.tanh(h @ params["w6"] + params["b6"])


if __name__ == "__main__":
    B, LATENT_DIM, VECTOR_SIZE, GAMMA_AVG = 8, 32, 64, 0.9

    key = jax.random.PRNGKey(0)
    kp, kz = jax.random.split(key)
    params = init_generator_params(kp, LATENT_DIM, VECTOR_SIZE)
    packed = pack_params(params, LATENT_DIM, VECTOR_SIZE)
    z = jax.random.normal(kz, (B, LATENT_DIM), jnp.float32)

    mean_w0 = jnp.zeros((1, LATENT_DIM), jnp.float32)   # self.mean_w starts as 0
    img, mean_w1 = generator_forward(
        z, mean_w0, packed, vector_size=VECTOR_SIZE, gamma_avg=GAMMA_AVG)
    jax.block_until_ready((img, mean_w1))

    assert img.shape == (B, VECTOR_SIZE)
    assert mean_w1.shape == (1, LATENT_DIM)

    # 1) Exact-semantics check against a reference with identical dtype strategy.
    ref_match = _reference_bf16(z, params)
    assert jnp.allclose(img, ref_match, atol=2e-3, rtol=2e-3)

    # 2) Fidelity check against full-f32 PyTorch semantics (bias included);
    #    tolerance covers bf16 quantization of the matmul operands only.
    ref_f32 = _reference_f32(z, params)
    assert jnp.allclose(img, ref_f32, atol=0.2)

    # 3) Fused mean_w EMA: step 1 from zero state, then a second step.
    zmean = jnp.mean(z, axis=0, keepdims=True)
    assert jnp.allclose(mean_w1, (1.0 - GAMMA_AVG) * zmean, atol=1e-6, rtol=1e-6)
    _, mean_w2 = generator_forward(
        z, mean_w1, packed, vector_size=VECTOR_SIZE, gamma_avg=GAMMA_AVG)
    jax.block_until_ready(mean_w2)
    assert jnp.allclose(mean_w2, GAMMA_AVG * mean_w1 + (1.0 - GAMMA_AVG) * zmean,
                        atol=1e-6, rtol=1e-6)

    print("KERNEL_OK")
</pallas_src>

<mosaic_0001>
module attributes {stable_mosaic.version = 11 : i64} {
  func.func @generator_kernel(%arg0: memref<8x128xf32, #tpu.memory_space<vmem>>, %arg1: memref<1x128xf32, #tpu.memory_space<vmem>>, %arg2: memref<384x128xbf16, #tpu.memory_space<vmem>>, %arg3: memref<16x512xf32, #tpu.memory_space<vmem>>, %arg4: memref<896x256xbf16, #tpu.memory_space<any>>, %arg5: memref<256x512xbf16, #tpu.memory_space<any>>, %arg6: memref<16x128xf32, #tpu.memory_space<vmem>>, %arg7: memref<896x256xbf16, #tpu.memory_space<vmem>>, %arg8: memref<256x512xbf16, #tpu.memory_space<vmem>>, %arg9: memref<2x!tpu.dma_semaphore, #tpu.memory_space<semaphore_mem>>) attributes {dimension_semantics = [], scalar_prefetch = 0 : i64, scratch_operands = 3 : i64, tpu.core_type = #tpu.core_type<tc>} {
    %c0_i32 = arith.constant 0 : i32
    %0 = tpu.memref_slice %arg9[%c0_i32] : memref<2x!tpu.dma_semaphore, #tpu.memory_space<semaphore_mem>> -> memref<1x!tpu.dma_semaphore, #tpu.memory_space<semaphore_mem>>
    %1 = tpu.memref_squeeze %0 : memref<1x!tpu.dma_semaphore, #tpu.memory_space<semaphore_mem>> -> memref<!tpu.dma_semaphore, #tpu.memory_space<semaphore_mem>>
    tpu.enqueue_dma source(%arg4 : memref<896x256xbf16, #tpu.memory_space<any>>) target(%arg7 : memref<896x256xbf16, #tpu.memory_space<vmem>>) target_semaphore(%1 : memref<!tpu.dma_semaphore, #tpu.memory_space<semaphore_mem>>)
    %c1_i32 = arith.constant 1 : i32
    %2 = tpu.memref_slice %arg9[%c1_i32] : memref<2x!tpu.dma_semaphore, #tpu.memory_space<semaphore_mem>> -> memref<1x!tpu.dma_semaphore, #tpu.memory_space<semaphore_mem>>
    %3 = tpu.memref_squeeze %2 : memref<1x!tpu.dma_semaphore, #tpu.memory_space<semaphore_mem>> -> memref<!tpu.dma_semaphore, #tpu.memory_space<semaphore_mem>>
    tpu.enqueue_dma source(%arg5 : memref<256x512xbf16, #tpu.memory_space<any>>) target(%arg8 : memref<256x512xbf16, #tpu.memory_space<vmem>>) target_semaphore(%3 : memref<!tpu.dma_semaphore, #tpu.memory_space<semaphore_mem>>)
    %c0 = arith.constant 0 : index
    %c0_0 = arith.constant 0 : index
    %4 = vector.load %arg0[%c0, %c0_0] : memref<8x128xf32, #tpu.memory_space<vmem>>, vector<8x128xf32>
    %cst = arith.constant dense<0.000000e+00> : vector<128xf32>
    %5 = vector.multi_reduction <add>, %4, %cst [0] : vector<8x128xf32> to vector<128xf32>
    %6 = vector.shape_cast %5 : vector<128xf32> to vector<1x128xf32>
    %cst_1 = arith.constant 8.000000e+00 : f32
    %7 = vector.broadcast %cst_1 : f32 to vector<1x128xf32>
    %8 = arith.divf %6, %7 : vector<1x128xf32>
    %c0_2 = arith.constant 0 : index
    %c0_3 = arith.constant 0 : index
    %9 = vector.load %arg1[%c0_2, %c0_3] : memref<1x128xf32, #tpu.memory_space<vmem>>, vector<1x128xf32>
    %cst_4 = arith.constant 0.899999976 : f32
    %10 = vector.broadcast %cst_4 : f32 to vector<1x128xf32>
    %11 = arith.mulf %10, %9 : vector<1x128xf32>
    %cst_5 = arith.constant 1.000000e-01 : f32
    %12 = vector.broadcast %cst_5 : f32 to vector<1x128xf32>
    %13 = arith.mulf %12, %8 : vector<1x128xf32>
    %14 = arith.addf %11, %13 : vector<1x128xf32>
    %15 = tpu.iota {dimensions = array<i32: 0>} : vector<8x128xi32>
    %c0_i32_6 = arith.constant 0 : i32
    %16 = vector.broadcast %c0_i32_6 : i32 to vector<8x128xi32>
    %17 = arith.cmpi eq, %15, %16 : vector<8x128xi32>
    %18 = vector.shape_cast %14 : vector<1x128xf32> to vector<1x128xf32>
    %19 = vector.broadcast %18 : vector<1x128xf32> to vector<8x128xf32>
    %cst_7 = arith.constant 0.000000e+00 : f32
    %20 = vector.broadcast %cst_7 : f32 to vector<8x128xf32>
    %21 = arith.select %17, %19, %20 : vector<8x128xi1>, vector<8x128xf32>
    %c8 = arith.constant 8 : index
    %c0_8 = arith.constant 0 : index
    %22 = vector.load %arg6[%c8, %c0_8] : memref<16x128xf32, #tpu.memory_space<vmem>>, vector<8x128xf32>
    tpu.vector_store %arg6[%c8, %c0_8], %21 {strides = array<i32>} : memref<16x128xf32, #tpu.memory_space<vmem>>, vector<8x128xf32>,
    %c0_9 = arith.constant 0 : index
    %c0_10 = arith.constant 0 : index
    %23 = vector.load %arg2[%c0_9, %c0_10] : memref<384x128xbf16, #tpu.memory_space<vmem>>, vector<128x128xbf16>
    %24 = arith.truncf %4 : vector<8x128xf32> to vector<8x128xbf16>
    %cst_11 = arith.constant dense<0.000000e+00> : vector<8x128xf32>
    %25 = tpu.matmul %24, %23, %cst_11 {dimension_numbers = #tpu.dot_dimension_numbers<[1], [0], [0], [1], [0, 0, 1, 1], [], []>} : vector<8x128xbf16>, vector<128x128xbf16>, vector<8x128xf32> -> vector<8x128xf32>
    %c0_12 = arith.constant 0 : index
    %c0_13 = arith.constant 0 : index
    %26 = vector.load %arg3[%c0_12, %c0_13] : memref<16x512xf32, #tpu.memory_space<vmem>>, vector<1x128xf32>
    %c5 = arith.constant 5 : index
    %c0_14 = arith.constant 0 : index
    %27 = vector.load %arg3[%c5, %c0_14] : memref<16x512xf32, #tpu.memory_space<vmem>>, vector<1x128xf32>
    %cst_15 = arith.constant dense<0.000000e+00> : vector<128xf32>
    %28 = vector.multi_reduction <add>, %25, %cst_15 [0] : vector<8x128xf32> to vector<128xf32>
    %29 = vector.shape_cast %28 : vector<128xf32> to vector<1x128xf32>
    %cst_16 = arith.constant 8.000000e+00 : f32
    %30 = vector.broadcast %cst_16 : f32 to vector<1x128xf32>
    %31 = arith.divf %29, %30 : vector<1x128xf32>
    %32 = arith.mulf %25, %25 : vector<8x128xf32>
    %cst_17 = arith.constant dense<0.000000e+00> : vector<128xf32>
    %33 = vector.multi_reduction <add>, %32, %cst_17 [0] : vector<8x128xf32> to vector<128xf32>
    %34 = vector.shape_cast %33 : vector<128xf32> to vector<1x128xf32>
    %cst_18 = arith.constant 8.000000e+00 : f32
    %35 = vector.broadcast %cst_18 : f32 to vector<1x128xf32>
    %36 = arith.divf %34, %35 : vector<1x128xf32>
    %37 = arith.mulf %31, %31 : vector<1x128xf32>
    %38 = arith.subf %36, %37 : vector<1x128xf32>
    %cst_19 = arith.constant 8.000000e-01 : f32
    %39 = vector.broadcast %cst_19 : f32 to vector<1x128xf32>
    %40 = arith.addf %38, %39 : vector<1x128xf32>
    %41 = math.rsqrt %40 : vector<1x128xf32>
    %42 = arith.mulf %26, %41 : vector<1x128xf32>
    %43 = arith.mulf %31, %42 : vector<1x128xf32>
    %44 = arith.subf %27, %43 : vector<1x128xf32>
    %45 = vector.broadcast %42 : vector<1x128xf32> to vector<8x128xf32>
    %46 = arith.mulf %25, %45 : vector<8x128xf32>
    %47 = vector.broadcast %44 : vector<1x128xf32> to vector<8x128xf32>
    %48 = arith.addf %46, %47 : vector<8x128xf32>
    %cst_20 = arith.constant 0.000000e+00 : f32
    %49 = vector.broadcast %cst_20 : f32 to vector<8x128xf32>
    %50 = arith.cmpf ogt, %48, %49 : vector<8x128xf32>
    %cst_21 = arith.constant 2.000000e-01 : f32
    %51 = vector.broadcast %cst_21 : f32 to vector<8x128xf32>
    %52 = arith.mulf %51, %48 : vector<8x128xf32>
    %53 = arith.select %50, %48, %52 : vector<8x128xi1>, vector<8x128xf32>
    %c0_i32_22 = arith.constant 0 : i32
    %54 = tpu.memref_slice %arg9[%c0_i32_22] : memref<2x!tpu.dma_semaphore, #tpu.memory_space<semaphore_mem>> -> memref<1x!tpu.dma_semaphore, #tpu.memory_space<semaphore_mem>>
    %55 = tpu.memref_squeeze %54 : memref<1x!tpu.dma_semaphore, #tpu.memory_space<semaphore_mem>> -> memref<!tpu.dma_semaphore, #tpu.memory_space<semaphore_mem>>
    tpu.wait_dma2 semaphore(%55 : memref<!tpu.dma_semaphore, #tpu.memory_space<semaphore_mem>>) src(%arg4 : memref<896x256xbf16, #tpu.memory_space<any>>) dst(%arg7 : memref<896x256xbf16, #tpu.memory_space<vmem>>)
    %c0_23 = arith.constant 0 : index
    %c0_24 = arith.constant 0 : index
    %56 = vector.load %arg7[%c0_23, %c0_24] : memref<896x256xbf16, #tpu.memory_space<vmem>>, vector<128x256xbf16>
    %57 = arith.truncf %53 : vector<8x128xf32> to vector<8x128xbf16>
    %cst_25 = arith.constant dense<0.000000e+00> : vector<8x256xf32>
    %58 = tpu.matmul %57, %56, %cst_25 {dimension_numbers = #tpu.dot_dimension_numbers<[1], [0], [0], [1], [0, 0, 1, 1], [], []>} : vector<8x128xbf16>, vector<128x256xbf16>, vector<8x256xf32> -> vector<8x256xf32>
    %c1 = arith.constant 1 : index
    %c0_26 = arith.constant 0 : index
    %59 = vector.load %arg3[%c1, %c0_26] : memref<16x512xf32, #tpu.memory_space<vmem>>, vector<1x256xf32>
    %c6 = arith.constant 6 : index
    %c0_27 = arith.constant 0 : index
    %60 = vector.load %arg3[%c6, %c0_27] : memref<16x512xf32, #tpu.memory_space<vmem>>, vector<1x256xf32>
    %cst_28 = arith.constant dense<0.000000e+00> : vector<256xf32>
    %61 = vector.multi_reduction <add>, %58, %cst_28 [0] : vector<8x256xf32> to vector<256xf32>
    %62 = vector.shape_cast %61 : vector<256xf32> to vector<1x256xf32>
    %cst_29 = arith.constant 8.000000e+00 : f32
    %63 = vector.broadcast %cst_29 : f32 to vector<1x256xf32>
    %64 = arith.divf %62, %63 : vector<1x256xf32>
    %65 = arith.mulf %58, %58 : vector<8x256xf32>
    %cst_30 = arith.constant dense<0.000000e+00> : vector<256xf32>
    %66 = vector.multi_reduction <add>, %65, %cst_30 [0] : vector<8x256xf32> to vector<256xf32>
    %67 = vector.shape_cast %66 : vector<256xf32> to vector<1x256xf32>
    %cst_31 = arith.constant 8.000000e+00 : f32
    %68 = vector.broadcast %cst_31 : f32 to vector<1x256xf32>
    %69 = arith.divf %67, %68 : vector<1x256xf32>
    %70 = arith.mulf %64, %64 : vector<1x256xf32>
    %71 = arith.subf %69, %70 : vector<1x256xf32>
    %cst_32 = arith.constant 8.000000e-01 : f32
    %72 = vector.broadcast %cst_32 : f32 to vector<1x256xf32>
    %73 = arith.addf %71, %72 : vector<1x256xf32>
    %74 = math.rsqrt %73 : vector<1x256xf32>
    %75 = arith.mulf %59, %74 : vector<1x256xf32>
    %76 = arith.mulf %64, %75 : vector<1x256xf32>
    %77 = arith.subf %60, %76 : vector<1x256xf32>
    %78 = vector.broadcast %75 : vector<1x256xf32> to vector<8x256xf32>
    %79 = arith.mulf %58, %78 : vector<8x256xf32>
    %80 = vector.broadcast %77 : vector<1x256xf32> to vector<8x256xf32>
    %81 = arith.addf %79, %80 : vector<8x256xf32>
    %cst_33 = arith.constant 0.000000e+00 : f32
    %82 = vector.broadcast %cst_33 : f32 to vector<8x256xf32>
    %83 = arith.cmpf ogt, %81, %82 : vector<8x256xf32>
    %cst_34 = arith.constant 2.000000e-01 : f32
    %84 = vector.broadcast %cst_34 : f32 to vector<8x256xf32>
    %85 = arith.mulf %84, %81 : vector<8x256xf32>
    %86 = arith.select %83, %81, %85 : vector<8x256xi1>, vector<8x256xf32>
    %c128 = arith.constant 128 : index
    %c0_35 = arith.constant 0 : index
    %87 = vector.load %arg7[%c128, %c0_35] : memref<896x256xbf16, #tpu.memory_space<vmem>>, vector<256x256xbf16>
    %88 = arith.truncf %86 : vector<8x256xf32> to vector<8x256xbf16>
    %cst_36 = arith.constant dense<0.000000e+00> : vector<8x256xf32>
    %89 = tpu.matmul %88, %87, %cst_36 {dimension_numbers = #tpu.dot_dimension_numbers<[1], [0], [0], [1], [0, 0, 1, 1], [], []>} : vector<8x256xbf16>, vector<256x256xbf16>, vector<8x256xf32> -> vector<8x256xf32>
    %c2 = arith.constant 2 : index
    %c0_37 = arith.constant 0 : index
    %90 = vector.load %arg3[%c2, %c0_37] : memref<16x512xf32, #tpu.memory_space<vmem>>, vector<1x256xf32>
    %c7 = arith.constant 7 : index
    %c0_38 = arith.constant 0 : index
    %91 = vector.load %arg3[%c7, %c0_38] : memref<16x512xf32, #tpu.memory_space<vmem>>, vector<1x256xf32>
    %cst_39 = arith.constant dense<0.000000e+00> : vector<256xf32>
    %92 = vector.multi_reduction <add>, %89, %cst_39 [0] : vector<8x256xf32> to vector<256xf32>
    %93 = vector.shape_cast %92 : vector<256xf32> to vector<1x256xf32>
    %cst_40 = arith.constant 8.000000e+00 : f32
    %94 = vector.broadcast %cst_40 : f32 to vector<1x256xf32>
    %95 = arith.divf %93, %94 : vector<1x256xf32>
    %96 = arith.mulf %89, %89 : vector<8x256xf32>
    %cst_41 = arith.constant dense<0.000000e+00> : vector<256xf32>
    %97 = vector.multi_reduction <add>, %96, %cst_41 [0] : vector<8x256xf32> to vector<256xf32>
    %98 = vector.shape_cast %97 : vector<256xf32> to vector<1x256xf32>
    %cst_42 = arith.constant 8.000000e+00 : f32
    %99 = vector.broadcast %cst_42 : f32 to vector<1x256xf32>
    %100 = arith.divf %98, %99 : vector<1x256xf32>
    %101 = arith.mulf %95, %95 : vector<1x256xf32>
    %102 = arith.subf %100, %101 : vector<1x256xf32>
    %cst_43 = arith.constant 8.000000e-01 : f32
    %103 = vector.broadcast %cst_43 : f32 to vector<1x256xf32>
    %104 = arith.addf %102, %103 : vector<1x256xf32>
    %105 = math.rsqrt %104 : vector<1x256xf32>
    %106 = arith.mulf %90, %105 : vector<1x256xf32>
    %107 = arith.mulf %95, %106 : vector<1x256xf32>
    %108 = arith.subf %91, %107 : vector<1x256xf32>
    %109 = vector.broadcast %106 : vector<1x256xf32> to vector<8x256xf32>
    %110 = arith.mulf %89, %109 : vector<8x256xf32>
    %111 = vector.broadcast %108 : vector<1x256xf32> to vector<8x256xf32>
    %112 = arith.addf %110, %111 : vector<8x256xf32>
    %cst_44 = arith.constant 0.000000e+00 : f32
    %113 = vector.broadcast %cst_44 : f32 to vector<8x256xf32>
    %114 = arith.cmpf ogt, %112, %113 : vector<8x256xf32>
    %cst_45 = arith.constant 2.000000e-01 : f32
    %115 = vector.broadcast %cst_45 : f32 to vector<8x256xf32>
    %116 = arith.mulf %115, %112 : vector<8x256xf32>
    %117 = arith.select %114, %112, %116 : vector<8x256xi1>, vector<8x256xf32>
    %c1_i32_46 = arith.constant 1 : i32
    %118 = tpu.memref_slice %arg9[%c1_i32_46] : memref<2x!tpu.dma_semaphore, #tpu.memory_space<semaphore_mem>> -> memref<1x!tpu.dma_semaphore, #tpu.memory_space<semaphore_mem>>
    %119 = tpu.memref_squeeze %118 : memref<1x!tpu.dma_semaphore, #tpu.memory_space<semaphore_mem>> -> memref<!tpu.dma_semaphore, #tpu.memory_space<semaphore_mem>>
    tpu.wait_dma2 semaphore(%119 : memref<!tpu.dma_semaphore, #tpu.memory_space<semaphore_mem>>) src(%arg5 : memref<256x512xbf16, #tpu.memory_space<any>>) dst(%arg8 : memref<256x512xbf16, #tpu.memory_space<vmem>>)
    %c0_47 = arith.constant 0 : index
    %c0_48 = arith.constant 0 : index
    %120 = vector.load %arg8[%c0_47, %c0_48] : memref<256x512xbf16, #tpu.memory_space<vmem>>, vector<256x512xbf16>
    %121 = arith.truncf %117 : vector<8x256xf32> to vector<8x256xbf16>
    %cst_49 = arith.constant dense<0.000000e+00> : vector<8x512xf32>
    %122 = tpu.matmul %121, %120, %cst_49 {dimension_numbers = #tpu.dot_dimension_numbers<[1], [0], [0], [1], [0, 0, 1, 1], [], []>} : vector<8x256xbf16>, vector<256x512xbf16>, vector<8x512xf32> -> vector<8x512xf32>
    %c3 = arith.constant 3 : index
    %c0_50 = arith.constant 0 : index
    %123 = vector.load %arg3[%c3, %c0_50] : memref<16x512xf32, #tpu.memory_space<vmem>>, vector<1x512xf32>
    %c8_51 = arith.constant 8 : index
    %c0_52 = arith.constant 0 : index
    %124 = vector.load %arg3[%c8_51, %c0_52] : memref<16x512xf32, #tpu.memory_space<vmem>>, vector<1x512xf32>
    %cst_53 = arith.constant dense<0.000000e+00> : vector<512xf32>
    %125 = vector.multi_reduction <add>, %122, %cst_53 [0] : vector<8x512xf32> to vector<512xf32>
    %126 = vector.shape_cast %125 : vector<512xf32> to vector<1x512xf32>
    %cst_54 = arith.constant 8.000000e+00 : f32
    %127 = vector.broadcast %cst_54 : f32 to vector<1x512xf32>
    %128 = arith.divf %126, %127 : vector<1x512xf32>
    %129 = arith.mulf %122, %122 : vector<8x512xf32>
    %cst_55 = arith.constant dense<0.000000e+00> : vector<512xf32>
    %130 = vector.multi_reduction <add>, %129, %cst_55 [0] : vector<8x512xf32> to vector<512xf32>
    %131 = vector.shape_cast %130 : vector<512xf32> to vector<1x512xf32>
    %cst_56 = arith.constant 8.000000e+00 : f32
    %132 = vector.broadcast %cst_56 : f32 to vector<1x512xf32>
    %133 = arith.divf %131, %132 : vector<1x512xf32>
    %134 = arith.mulf %128, %128 : vector<1x512xf32>
    %135 = arith.subf %133, %134 : vector<1x512xf32>
    %cst_57 = arith.constant 8.000000e-01 : f32
    %136 = vector.broadcast %cst_57 : f32 to vector<1x512xf32>
    %137 = arith.addf %135, %136 : vector<1x512xf32>
    %138 = math.rsqrt %137 : vector<1x512xf32>
    %139 = arith.mulf %123, %138 : vector<1x512xf32>
    %140 = arith.mulf %128, %139 : vector<1x512xf32>
    %141 = arith.subf %124, %140 : vector<1x512xf32>
    %142 = vector.broadcast %139 : vector<1x512xf32> to vector<8x512xf32>
    %143 = arith.mulf %122, %142 : vector<8x512xf32>
    %144 = vector.broadcast %141 : vector<1x512xf32> to vector<8x512xf32>
    %145 = arith.addf %143, %144 : vector<8x512xf32>
    %cst_58 = arith.constant 0.000000e+00 : f32
    %146 = vector.broadcast %cst_58 : f32 to vector<8x512xf32>
    %147 = arith.cmpf ogt, %145, %146 : vector<8x512xf32>
    %cst_59 = arith.constant 2.000000e-01 : f32
    %148 = vector.broadcast %cst_59 : f32 to vector<8x512xf32>
    %149 = arith.mulf %148, %145 : vector<8x512xf32>
    %150 = arith.select %147, %145, %149 : vector<8x512xi1>, vector<8x512xf32>
    %c384 = arith.constant 384 : index
    %c0_60 = arith.constant 0 : index
    %151 = vector.load %arg7[%c384, %c0_60] : memref<896x256xbf16, #tpu.memory_space<vmem>>, vector<512x256xbf16>
    %152 = arith.truncf %150 : vector<8x512xf32> to vector<8x512xbf16>
    %cst_61 = arith.constant dense<0.000000e+00> : vector<8x256xf32>
    %153 = tpu.matmul %152, %151, %cst_61 {dimension_numbers = #tpu.dot_dimension_numbers<[1], [0], [0], [1], [0, 0, 1, 1], [], []>} : vector<8x512xbf16>, vector<512x256xbf16>, vector<8x256xf32> -> vector<8x256xf32>
    %c4 = arith.constant 4 : index
    %c0_62 = arith.constant 0 : index
    %154 = vector.load %arg3[%c4, %c0_62] : memref<16x512xf32, #tpu.memory_space<vmem>>, vector<1x256xf32>
    %c9 = arith.constant 9 : index
    %c0_63 = arith.constant 0 : index
    %155 = vector.load %arg3[%c9, %c0_63] : memref<16x512xf32, #tpu.memory_space<vmem>>, vector<1x256xf32>
    %cst_64 = arith.constant dense<0.000000e+00> : vector<256xf32>
    %156 = vector.multi_reduction <add>, %153, %cst_64 [0] : vector<8x256xf32> to vector<256xf32>
    %157 = vector.shape_cast %156 : vector<256xf32> to vector<1x256xf32>
    %cst_65 = arith.constant 8.000000e+00 : f32
    %158 = vector.broadcast %cst_65 : f32 to vector<1x256xf32>
    %159 = arith.divf %157, %158 : vector<1x256xf32>
    %160 = arith.mulf %153, %153 : vector<8x256xf32>
    %cst_66 = arith.constant dense<0.000000e+00> : vector<256xf32>
    %161 = vector.multi_reduction <add>, %160, %cst_66 [0] : vector<8x256xf32> to vector<256xf32>
    %162 = vector.shape_cast %161 : vector<256xf32> to vector<1x256xf32>
    %cst_67 = arith.constant 8.000000e+00 : f32
    %163 = vector.broadcast %cst_67 : f32 to vector<1x256xf32>
    %164 = arith.divf %162, %163 : vector<1x256xf32>
    %165 = arith.mulf %159, %159 : vector<1x256xf32>
    %166 = arith.subf %164, %165 : vector<1x256xf32>
    %cst_68 = arith.constant 8.000000e-01 : f32
    %167 = vector.broadcast %cst_68 : f32 to vector<1x256xf32>
    %168 = arith.addf %166, %167 : vector<1x256xf32>
    %169 = math.rsqrt %168 : vector<1x256xf32>
    %170 = arith.mulf %154, %169 : vector<1x256xf32>
    %171 = arith.mulf %159, %170 : vector<1x256xf32>
    %172 = arith.subf %155, %171 : vector<1x256xf32>
    %173 = vector.broadcast %170 : vector<1x256xf32> to vector<8x256xf32>
    %174 = arith.mulf %153, %173 : vector<8x256xf32>
    %175 = vector.broadcast %172 : vector<1x256xf32> to vector<8x256xf32>
    %176 = arith.addf %174, %175 : vector<8x256xf32>
    %cst_69 = arith.constant 0.000000e+00 : f32
    %177 = vector.broadcast %cst_69 : f32 to vector<8x256xf32>
    %178 = arith.cmpf ogt, %176, %177 : vector<8x256xf32>
    %cst_70 = arith.constant 2.000000e-01 : f32
    %179 = vector.broadcast %cst_70 : f32 to vector<8x256xf32>
    %180 = arith.mulf %179, %176 : vector<8x256xf32>
    %181 = arith.select %178, %176, %180 : vector<8x256xi1>, vector<8x256xf32>
    %c128_71 = arith.constant 128 : index
    %c0_72 = arith.constant 0 : index
    %182 = vector.load %arg2[%c128_71, %c0_72] : memref<384x128xbf16, #tpu.memory_space<vmem>>, vector<256x128xbf16>
    %183 = arith.truncf %181 : vector<8x256xf32> to vector<8x256xbf16>
    %cst_73 = arith.constant dense<0.000000e+00> : vector<8x128xf32>
    %184 = tpu.matmul %183, %182, %cst_73 {dimension_numbers = #tpu.dot_dimension_numbers<[1], [0], [0], [1], [0, 0, 1, 1], [], []>} : vector<8x256xbf16>, vector<256x128xbf16>, vector<8x128xf32> -> vector<8x128xf32>
    %c10 = arith.constant 10 : index
    %c0_74 = arith.constant 0 : index
    %185 = vector.load %arg3[%c10, %c0_74] : memref<16x512xf32, #tpu.memory_space<vmem>>, vector<1x128xf32>
    %186 = vector.broadcast %185 : vector<1x128xf32> to vector<8x128xf32>
    %187 = arith.addf %184, %186 : vector<8x128xf32>
    %188 = math.tanh %187 : vector<8x128xf32>
    %c0_75 = arith.constant 0 : index
    %c0_76 = arith.constant 0 : index
    %189 = vector.load %arg6[%c0_75, %c0_76] : memref<16x128xf32, #tpu.memory_space<vmem>>, vector<8x128xf32>
    tpu.vector_store %arg6[%c0_75, %c0_76], %188 {strides = array<i32>} : memref<16x128xf32, #tpu.memory_space<vmem>>, vector<8x128xf32>,
    return
  }
}

</mosaic_0001>

<bundles_post_ra>
// kernel: generator_forward.1
= control target key start
LH: loop header
LB: loop body
LE: loop exit
PB: predicated region body
PF: predicated region fallthrough
CT: control target
= control target key end

     0   :  { %11 = vsyncpa [#allocation6], 0  ;;  %s3684_s0 = inlined_call_operand.vmem [shape: f32[8,128], index: 0, kind: input, shape index: {}]   ;;  %s3685_s1 = inlined_call_operand.vmem [shape: f32[1,128], index: 1, kind: input, shape index: {}]   ;;  %s3686_s2 = inlined_call_operand.hbm [shape: bf16[384,128], index: 2, kind: input, shape index: {}]   ;;  %s3687_s3 = inlined_call_operand.hbm [shape: f32[16,512], index: 3, kind: input, shape index: {}]   ;;  %s3688_s4 = inlined_call_operand.hbm [shape: bf16[896,256], index: 4, kind: input, shape index: {}]   ;;  %s3689_s5 = inlined_call_operand.hbm [shape: bf16[256,512], index: 5, kind: input, shape index: {}]   ;;  %s3690_s6 = inlined_call_operand.vmem [shape: f32[16,128], index: 6, kind: output, shape index: {}]  }
   0x1   :  { %s21_s23 = sshll.u32 %s3686_s2, 4  ;;  %s22_s23 = int_to_ptr.hbm [resolvable:$true] %s21_s23 }
   0x2   :  { %12 = vsyncpa [#allocation8], 0  ;;  %s3366_s24 = smov [#allocation5]   ;;  %s34_s28 = sshll.u32 %s3687_s3, 4  ;;  %s35_s28 = int_to_ptr.hbm [resolvable:$true] %s34_s28 }
   0x3   :  { %s23_s25 = sshll.u32 %s3366_s24, 4  ;;  %s3367_s29 = smov 64   ;;  %s24_s25 = int_to_ptr.vmem [resolvable:$true] %s23_s25 }
   0x4   :  { %s3368_s30 = smov 4   ;;  %s3369_s7 = smov [#allocation7]  }
   0x5   :  { %29 = dma.hbm_to_vmem [thread:$0]  %s22_s23, 3072, %s24_s25, [#allocation6], %s3367_s29, %s3367_s29, %s3368_s30  }
   0x6   :  { %s36_s8 = sshll.u32 %s3369_s7, 4  ;;  %s3370_s9 = smov 512   ;;  %s37_s8 = int_to_ptr.vmem [resolvable:$true] %s36_s8 }
   0x7   :  { %s3371_s10 = smov 32  }
   0x8   :  { %42 = dma.hbm_to_vmem [thread:$0]  %s35_s28, 1024, %s37_s8, [#allocation8], %s3370_s9, %s3370_s9, %s3371_s10  }
   0x9   :  { %3358 = dma.done.wait [#allocation6], 3072  }
   0xa   :  { %3359 = vsyncadd [#allocation6], 4294964224 }
   0xb   :  { %3360 = dma.done.wait [#allocation8], 1024  }
   0xc   :  { %3361 = vsyncadd [#allocation8], 4294966272  ;;  %v3372_v0 = vmov 8.0   ;;  %v3034_v1 = vld [vmem:[#allocation5 + $0x38] sm:$0xff]  ;;  %v3033_v2 = vld [vmem:[#allocation5 + $0x30] sm:$0xff]  ;;  %v97_v17 = vlaneseq  ;;  %s58_s15 = sshll.u32 %s3688_s4, 4  ;;  %s59_s15 = int_to_ptr.hbm [resolvable:$true] %s58_s15 }
   0xd   :  { %3236 = vrcp.f32 %v3372_v0  ;;  %170 = vmatpush.bf16.msra.mxu0 %v3034_v1  ;;  %v78_v3 = vld [vmem:[%s3684_s0] sm:$0xff]  ;;  %v3032_v7 = vld [vmem:[#allocation5 + $0x28] sm:$0xff]  ;;  %v3030_v19 = vld [vmem:[#allocation5 + $0x18] sm:$0xff]  ;;  %s3373_s16 = smov [#allocation2]   ;;  %s72_s20 = sshll.u32 %s3689_s5, 4  ;;  %s73_s20 = int_to_ptr.hbm [resolvable:$true] %s72_s20 }
   0xe   :  { %v79_v4 = vrot.slane %v78_v3, 4  ;;  %v3031_v12 = vld [vmem:[#allocation5 + $0x20] sm:$0xff]  ;;  %v98_v23 = vshrl.u32 %v97_v17, 7  ;;  %v3029_v25 = vld [vmem:[#allocation5 + $0x10] sm:$0xff]  ;;  %v3028_v28 = vld [vmem:[#allocation5 + $0x8] sm:$0xff]  ;;  %v121_v31 = vpack.c.bf16 %v78_v3, %v78_v3  ;;  %s60_s17 = sshll.u32 %s3373_s16, 4  ;;  %s61_s17 = int_to_ptr.vmem [resolvable:$true] %s60_s17 }
   0xf   :  { %v93_v16 = vld [vmem:[%s3685_s1] sm:$0x1]  ;;  %63 = dma.hbm_to_vmem [thread:$0]  %s59_s15, 14336, %s61_s17, [#allocation4]  ;;  %v184_v61 = vld [vmem:[#allocation7 + $0x5] ss:$0 sm:$0xff] }
  0x10   :  { %v80_v6 = vadd.f32 %v79_v4, %v78_v3  ;;  %v94_v22 = vmul.f32 0.9, %v93_v16  ;;  %vm99_vm1 = vcmp.eq.s32.totalorder %v98_v23, 0  ;;  %v3027_v30 = vld [vmem:[#allocation5] sm:$0xff]  ;;  %s3374_s21 = smov [#allocation3]  }
  0x11   :  { %171 = vmatpush.bf16.msra.mxu0 %v3033_v2  ;;  %s74_s22 = sshll.u32 %s3374_s21, 4  ;;  %v183_v57 = vld [vmem:[#allocation7] ss:$0 sm:$0xff]  ;;  %s75_s22 = int_to_ptr.vmem [resolvable:$true] %s74_s22 }
  0x12   :  { %v81_v9 = vrot.slane %v80_v6, 2  ;;  %77 = dma.hbm_to_vmem [thread:$0]  %s73_s20, 8192, %s75_s22, [#allocation4 + $0x1] }
  0x13   :  { %v3237_v5 = vpop.eup %3236 }
  0x14   :  { %v86_v8 = vmul.f32 8.0, %v3237_v5  ;;  %v82_v11 = vadd.f32 %v81_v9, %v80_v6  ;;  %vm90_vm0 = vweird.f32 %v3237_v5 }
  0x15   :  { %172 = vmatpush.bf16.msra.mxu0 %v3032_v7 }
  0x16   :  { %v87_v10 = vsub.f32 1.0, %v86_v8  ;;  %v83_v14 = vrot.slane %v82_v11, 1 }
  0x18   :  { %v88_v13 = vmul.f32 %v3237_v5, %v87_v10  ;;  %v84_v18 = vadd.f32 %v83_v14, %v82_v11 }
  0x19   :  { %173 = vmatpush.bf16.msra.mxu0 %v3031_v12 }
  0x1a   :  { %v89_v15 = vadd.f32 %v3237_v5, %v88_v13 }
  0x1c   :  { %v3422_v20 = vsel %vm90_vm0, %v3237_v5, %v89_v15 }
  0x1d   :  { %v92_v21 = vmul.f32 %v3422_v20, %v84_v18  ;;  %174 = vmatpush.bf16.msra.mxu0 %v3030_v19 }
  0x1f   :  { %v95_v24 = vmul.f32 0.1, %v92_v21 }
  0x21   :  { %v96_v26 = vadd.f32 %v95_v24, %v94_v22  ;;  %175 = vmatpush.bf16.msra.mxu0 %v3029_v25 }
  0x23   :  { %v101_v27 = vperm.slane %v96_v26, 0 }
  0x25   :  { %v103_v29 = vsel %vm99_vm1, %v101_v27, 0.0  ;;  %176 = vmatpush.bf16.msra.mxu0 %v3028_v28 }
  0x26   :  { %104 = vst [vmem:[%s3690_s6 + $0x8] sm:$0xff] %v103_v29 }
  0x29   :  { %177 = vmatpush.bf16.msra.mxu0 %v3027_v30 }
  0x2c   :  { %178 = vmatmul.bf16.vlgmr.msra.gmra.mxu0 %v121_v31 }
  0xa9   :  { %v179_v32 = vpop.f32.mrf.mxu0 }
  0xaa   :  { %v185_v33 = vrot.slane %v179_v32, 4  ;;  %v192_v34 = vmul.f32 %v179_v32, %v179_v32 }
  0xac   :  { %v186_v35 = vadd.f32 %v185_v33, %v179_v32  ;;  %v193_v36 = vrot.slane %v192_v34, 4 }
  0xae   :  { %v187_v37 = vrot.slane %v186_v35, 2  ;;  %v194_v38 = vadd.f32 %v193_v36, %v192_v34 }
  0xb0   :  { %v188_v39 = vadd.f32 %v187_v37, %v186_v35  ;;  %v195_v40 = vrot.slane %v194_v38, 2 }
  0xb1   :  { %v181_v41 = vpop.f32.mrf.mxu0 }
  0xb2   :  { %v189_v42 = vrot.slane %v188_v39, 1  ;;  %v196_v43 = vadd.f32 %v195_v40, %v194_v38 }
  0xb4   :  { %v190_v44 = vadd.f32 %v189_v42, %v188_v39  ;;  %v197_v45 = vrot.slane %v196_v43, 1 }
  0xb6   :  { %v191_v46 = vmul.f32 %v190_v44, %v3422_v20  ;;  %v198_v47 = vadd.f32 %v197_v45, %v196_v43 }
  0xb8   :  { %v199_v48 = vmul.f32 %v198_v47, %v3422_v20  ;;  %v200_v49 = vmul.f32 %v191_v46, %v191_v46 }
  0xba   :  { %v201_v50 = vsub.f32 %v199_v48, %v200_v49 }
  0xbc   :  { %v202_v51 = vadd.f32 0.8, %v201_v50 }
  0xbe   :  { %3238 = vrsqrt.f32 %v202_v51  ;;  %vm209_vm3 = vweird.f32 %v202_v51 }
  0xc4   :  { %v3239_v52 = vpop.eup %3238 }
  0xc5   :  { %v204_v53 = vmul.f32 %v3239_v52, %v202_v51  ;;  %vm210_vm2 = vweird.f32 %v3239_v52 }
  0xc6   :  { %vm211_vm4 = vmor %vm209_vm3, %vm210_vm2 }
  0xc7   :  { %v205_v54 = vmul.f32 %v3239_v52, %v204_v53 }
  0xc9   :  { %v206_v55 = vmul.f32 0.5, %v205_v54 }
  0xcb   :  { %v207_v56 = vsub.f32 1.5, %v206_v55 }
  0xcd   :  { %v208_v58 = vmul.f32 %v3239_v52, %v207_v56 }
  0xcf   :  { %v212_v59 = vsel %vm211_vm4, %v3239_v52, %v208_v58 }
  0xd0   :  { %v213_v60 = vmul.f32 %v212_v59, %v183_v57 }
  0xd2   :  { %v214_v62 = vmul.f32 %v213_v60, %v191_v46  ;;  %v216_v0 = vmul.f32 %v213_v60, %v179_v32 }
  0xd4   :  { %v215_v63 = vsub.f32 %v184_v61, %v214_v62 }
  0xd6   :  { %v217_v1 = vadd.f32 %v216_v0, %v215_v63 }
  0xd8   :  { %vm218_vm5 = vcmp.gt.f32.partialorder %v217_v1, 0.0  ;;  %v219_v2 = vmul.f32 0.2, %v217_v1 }
  0xda   :  { %v3436_v3 = vsel %vm218_vm5, %v217_v1, %v219_v2 }
  0xdb   :  { %3362 = dma.done.wait [#allocation4], 14336 }
  0xdc   :  { %3363 = vsyncadd [#allocation4], 4294952960  ;;  %v2315_v4 = vld [vmem:[#allocation2 + $0x70] sm:$0xf]  ;;  %v3050_v5 = vld [vmem:[#allocation2 + $0x74] sm:$0xf0]  ;;  %v241_v53 = vpack.c.bf16 %v3436_v3, %v3436_v3 }
  0xdd   :  { %v3049_v6 = vld [vmem:[#allocation2 + $0x74] sm:$0xf]  ;;  %v2316_v7 = vor.u32 %v3050_v5, %v2315_v4  ;;  %v2317_v8 = vld [vmem:[#allocation2 + $0x78] sm:$0xf0]  ;;  %v2307_v9 = vld [vmem:[#allocation2 + $0x60] sm:$0xf] }
  0xde   :  { %v3048_v10 = vld [vmem:[#allocation2 + $0x64] sm:$0xf0]  ;;  %v2320_v11 = vor.u32 %v3049_v6, %v2317_v8  ;;  %v3047_v12 = vld [vmem:[#allocation2 + $0x64] sm:$0xf]  ;;  %v2309_v13 = vld [vmem:[#allocation2 + $0x68] sm:$0xf0] }
  0xdf   :  { %322 = vmatpush.bf16.msra.mxu1 %v2316_v7  ;;  %v2308_v14 = vor.u32 %v3048_v10, %v2307_v9  ;;  %v2312_v15 = vor.u32 %v3047_v12, %v2309_v13  ;;  %v2299_v16 = vld [vmem:[#allocation2 + $0x50] sm:$0xf]  ;;  %v3046_v17 = vld [vmem:[#allocation2 + $0x54] sm:$0xf0]  ;;  %v3045_v18 = vld [vmem:[#allocation2 + $0x54] sm:$0xf] }
  0xe0   :  { %335 = vmatpush.bf16.msra.mxu2 %v2320_v11  ;;  %v2301_v19 = vld [vmem:[#allocation2 + $0x58] sm:$0xf0]  ;;  %v2300_v21 = vor.u32 %v3046_v17, %v2299_v16  ;;  %v2291_v23 = vld [vmem:[#allocation2 + $0x40] sm:$0xf]  ;;  %v3044_v24 = vld [vmem:[#allocation2 + $0x44] sm:$0xf0] }
  0xe1   :  { %v2304_v22 = vor.u32 %v3045_v18, %v2301_v19  ;;  %v3043_v25 = vld [vmem:[#allocation2 + $0x44] sm:$0xf]  ;;  %v2293_v26 = vld [vmem:[#allocation2 + $0x48] sm:$0xf0]  ;;  %v2292_v27 = vor.u32 %v3044_v24, %v2291_v23  ;;  %v2283_v29 = vld [vmem:[#allocation2 + $0x30] sm:$0xf] }
  0xe2   :  { %v2296_v28 = vor.u32 %v3043_v25, %v2293_v26  ;;  %v3042_v30 = vld [vmem:[#allocation2 + $0x34] sm:$0xf0]  ;;  %v3041_v31 = vld [vmem:[#allocation2 + $0x34] sm:$0xf]  ;;  %v2285_v32 = vld [vmem:[#allocation2 + $0x38] sm:$0xf0] }
  0xe3   :  { %323 = vmatpush.bf16.msra.mxu1 %v2308_v14  ;;  %v2284_v33 = vor.u32 %v3042_v30, %v2283_v29  ;;  %v2288_v34 = vor.u32 %v3041_v31, %v2285_v32  ;;  %v2275_v35 = vld [vmem:[#allocation2 + $0x20] sm:$0xf]  ;;  %v3040_v36 = vld [vmem:[#allocation2 + $0x24] sm:$0xf0]  ;;  %v3039_v37 = vld [vmem:[#allocation2 + $0x24] sm:$0xf] }
  0xe4   :  { %336 = vmatpush.bf16.msra.mxu2 %v2312_v15  ;;  %v2277_v38 = vld [vmem:[#allocation2 + $0x28] sm:$0xf0]  ;;  %v2276_v39 = vor.u32 %v3040_v36, %v2275_v35  ;;  %v2267_v41 = vld [vmem:[#allocation2 + $0x10] sm:$0xf]  ;;  %v3038_v42 = vld [vmem:[#allocation2 + $0x14] sm:$0xf0] }
  0xe5   :  { %v2280_v40 = vor.u32 %v3039_v37, %v2277_v38  ;;  %v3037_v43 = vld [vmem:[#allocation2 + $0x14] sm:$0xf]  ;;  %v2269_v44 = vld [vmem:[#allocation2 + $0x18] sm:$0xf0]  ;;  %v2268_v45 = vor.u32 %v3038_v42, %v2267_v41  ;;  %v2259_v47 = vld [vmem:[#allocation2] sm:$0xf] }
  0xe6   :  { %v2272_v46 = vor.u32 %v3037_v43, %v2269_v44  ;;  %v3036_v48 = vld [vmem:[#allocation2 + $0x4] sm:$0xf0]  ;;  %v3035_v49 = vld [vmem:[#allocation2 + $0x4] sm:$0xf]  ;;  %v2261_v50 = vld [vmem:[#allocation2 + $0x8] sm:$0xf0] }
  0xe7   :  { %324 = vmatpush.bf16.msra.mxu1 %v2300_v21  ;;  %v2260_v51 = vor.u32 %v3036_v48, %v2259_v47  ;;  %v2264_v52 = vor.u32 %v3035_v49, %v2261_v50  ;;  %v2379_v59 = vld [vmem:[#allocation2 + $0xf0] sm:$0xf]  ;;  %v3066_v60 = vld [vmem:[#allocation2 + $0xf4] sm:$0xf0]  ;;  %v3065_v0 = vld [vmem:[#allocation2 + $0xf4] sm:$0xf] }
  0xe8   :  { %337 = vmatpush.bf16.msra.mxu2 %v2304_v22  ;;  %v2380_v61 = vor.u32 %v3066_v60, %v2379_v59  ;;  %v2443_v62 = vld [vmem:[#allocation2 + $0x170] sm:$0xf]  ;;  %v3082_v63 = vld [vmem:[#allocation2 + $0x174] sm:$0xf0]  ;;  %v2381_v4 = vld [vmem:[#allocation2 + $0xf8] sm:$0xf0] }
  0xe9   :  { %v2444_v3 = vor.u32 %v3082_v63, %v2443_v62  ;;  %v3081_v5 = vld [vmem:[#allocation2 + $0x174] sm:$0xf]  ;;  %v2384_v6 = vor.u32 %v3065_v0, %v2381_v4  ;;  %v2445_v7 = vld [vmem:[#allocation2 + $0x178] sm:$0xf0]  ;;  %v2371_v12 = vld [vmem:[#allocation2 + $0xe0] sm:$0xf] }
  0xea   :  { %637 = vmatpush.bf16.msra.mxu3 %v2380_v61  ;;  %v2448_v11 = vor.u32 %v3081_v5, %v2445_v7  ;;  %v3064_v13 = vld [vmem:[#allocation2 + $0xe4] sm:$0xf0]  ;;  %v2435_v18 = vld [vmem:[#allocation2 + $0x160] sm:$0xf]  ;;  %v3063_v24 = vld [vmem:[#allocation2 + $0xe4] sm:$0xf] }
  0xeb   :  { %325 = vmatpush.bf16.msra.mxu1 %v2292_v27  ;;  %650 = vmatpush.bf16.msrb.mxu0 %v2444_v3  ;;  %v2372_v17 = vor.u32 %v3064_v13, %v2371_v12  ;;  %v3080_v19 = vld [vmem:[#allocation2 + $0x164] sm:$0xf0]  ;;  %v2373_v25 = vld [vmem:[#allocation2 + $0xe8] sm:$0xf0]  ;;  %v3079_v29 = vld [vmem:[#allocation2 + $0x164] sm:$0xf] }
  0xec   :  { %338 = vmatpush.bf16.msra.mxu2 %v2296_v28  ;;  %v2436_v23 = vor.u32 %v3080_v19, %v2435_v18  ;;  %v2376_v28 = vor.u32 %v3063_v24, %v2373_v25  ;;  %v2437_v30 = vld [vmem:[#allocation2 + $0x168] sm:$0xf0]  ;;  %v3062_v35 = vld [vmem:[#allocation2 + $0xd4] sm:$0xf0]  ;;  %v3061_v44 = vld [vmem:[#allocation2 + $0xd4] sm:$0xf] }
  0xed   :  { %v2429_v50 = vld [vmem:[#allocation2 + $0x158] sm:$0xf0]  ;;  %v3076_v62 = vld [vmem:[#allocation2 + $0x144] sm:$0xf0]  ;;  %v3059_v63 = vld [vmem:[#allocation2 + $0xc4] sm:$0xf] }
  0xee   :  { %638 = vmatpush.bf16.msra.mxu3 %v2372_v17  ;;  %v3075_v3 = vld [vmem:[#allocation2 + $0x144] sm:$0xf]  ;;  %v2421_v4 = vld [vmem:[#allocation2 + $0x148] sm:$0xf0]  ;;  %v3058_v12 = vld [vmem:[#allocation2 + $0xb4] sm:$0xf0] }
  0xef   :  { %326 = vmatpush.bf16.msra.mxu1 %v2284_v33  ;;  %651 = vmatpush.bf16.msrb.mxu0 %v2436_v23  ;;  %v2440_v33 = vor.u32 %v3079_v29, %v2437_v30  ;;  %v3074_v17 = vld [vmem:[#allocation2 + $0x134] sm:$0xf0]  ;;  %v3057_v18 = vld [vmem:[#allocation2 + $0xb4] sm:$0xf]  ;;  %v2413_v23 = vld [vmem:[#allocation2 + $0x138] sm:$0xf0] }
  0xf0   :  { %339 = vmatpush.bf16.msra.mxu2 %v2288_v34  ;;  %v2363_v34 = vld [vmem:[#allocation2 + $0xd0] sm:$0xf]  ;;  %v3056_v29 = vld [vmem:[#allocation2 + $0xa4] sm:$0xf0]  ;;  %v2403_v30 = vld [vmem:[#allocation2 + $0x120] sm:$0xf] }
  0xf1   :  { %v2364_v38 = vor.u32 %v3062_v35, %v2363_v34  ;;  %v3055_v34 = vld [vmem:[#allocation2 + $0xa4] sm:$0xf]  ;;  %v2341_v35 = vld [vmem:[#allocation2 + $0xa8] sm:$0xf0]  ;;  %vm411_vm11 = vcmask 1040384  }
  0xf3   :  { %327 = vmatpush.bf16.msra.mxu1 %v2276_v39  ;;  %v2427_v39 = vld [vmem:[#allocation2 + $0x150] sm:$0xf]  ;;  %639 = vmatpush.bf16.msra.mxu3 %v2364_v38  ;;  %v3071_v38 = vld [vmem:[#allocation2 + $0x124] sm:$0xf] }
  0xf4   :  { %340 = vmatpush.bf16.msra.mxu2 %v2280_v40  ;;  %v3078_v40 = vld [vmem:[#allocation2 + $0x154] sm:$0xf0] }
  0xf5   :  { %v2428_v43 = vor.u32 %v3078_v40, %v2427_v39  ;;  %v2405_v39 = vld [vmem:[#allocation2 + $0x128] sm:$0xf0]  ;;  %v2331_v40 = vld [vmem:[#allocation2 + $0x90] sm:$0xf] }
  0xf7   :  { %328 = vmatpush.bf16.msra.mxu1 %v2268_v45  ;;  %v2365_v45 = vld [vmem:[#allocation2 + $0xd8] sm:$0xf0]  ;;  %652 = vmatpush.bf16.msrb.mxu0 %v2428_v43  ;;  %v2408_v43 = vor.u32 %v3071_v38, %v2405_v39 }
  0xf8   :  { %341 = vmatpush.bf16.msra.mxu2 %v2272_v46  ;;  %v3077_v46 = vld [vmem:[#allocation2 + $0x154] sm:$0xf]  ;;  %v2368_v49 = vor.u32 %v3061_v44, %v2365_v45  ;;  %v3054_v44 = vld [vmem:[#allocation2 + $0x94] sm:$0xf0]  ;;  %v2395_v45 = vld [vmem:[#allocation2 + $0x110] sm:$0xf] }
  0xfb   :  { %329 = vmatpush.bf16.msra.mxu1 %v2260_v51 }
  0xfc   :  { %342 = vmatpush.bf16.msra.mxu2 %v2264_v52 }
  0xfe   :  { %330 = vmatmul.bf16.vlgmr.msra.gmra.mxu1 %v241_v53 }
  0xff   :  { %343 = vmatmul.bf16.vlgmr.msra.gmra.mxu2 %v241_v53  ;;  %663 = vmatpush.bf16.msrb.mxu1 %v2384_v6 }
 0x100   :  { %676 = vmatpush.bf16.msrb.mxu2 %v2448_v11  ;;  %v2347_v11 = vld [vmem:[#allocation2 + $0xb0] sm:$0xf] }
 0x103   :  { %664 = vmatpush.bf16.msrb.mxu1 %v2376_v28  ;;  %v2339_v28 = vld [vmem:[#allocation2 + $0xa0] sm:$0xf] }
 0x104   :  { %677 = vmatpush.bf16.msrb.mxu2 %v2440_v33  ;;  %v3072_v33 = vld [vmem:[#allocation2 + $0x124] sm:$0xf0] }
 0x107   :  { %665 = vmatpush.bf16.msrb.mxu1 %v2368_v49  ;;  %v3053_v49 = vld [vmem:[#allocation2 + $0x94] sm:$0xf] }
 0x17b   :  { %v3440_v54 = vpop.f32.mrf.mxu1 }
 0x17c   :  { %v352_v55 = vrot.slane %v3440_v54, 4  ;;  %v366_v56 = vmul.f32 %v3440_v54, %v3440_v54 }
 0x17e   :  { %v353_v57 = vadd.f32 %v352_v55, %v3440_v54  ;;  %v368_v58 = vrot.slane %v366_v56, 4  ;;  %v2432_v55 = vor.u32 %v3077_v46, %v2429_v50  ;;  %v2333_v50 = vld [vmem:[#allocation2 + $0x98] sm:$0xf0] }
 0x180   :  { %v354_v1 = vrot.slane %v353_v57, 2  ;;  %v369_v2 = vadd.f32 %v368_v58, %v366_v56  ;;  %v2355_v56 = vld [vmem:[#allocation2 + $0xc0] sm:$0xf]  ;;  %678 = vmatpush.bf16.msrb.mxu2 %v2432_v55 }
 0x181   :  { %v2419_v58 = vld [vmem:[#allocation2 + $0x140] sm:$0xf] }
 0x182   :  { %v355_v8 = vadd.f32 %v354_v1, %v353_v57  ;;  %v370_v9 = vrot.slane %v369_v2, 2  ;;  %v3446_v10 = vpop.f32.mrf.mxu2  ;;  %v3060_v57 = vld [vmem:[#allocation2 + $0xc4] sm:$0xf0]  ;;  %v2420_v1 = vor.u32 %v3076_v62, %v2419_v58  ;;  %v2323_v55 = vld [vmem:[#allocation2 + $0x80] sm:$0xf] }
 0x183   :  { %v358_v14 = vrot.slane %v3446_v10, 4  ;;  %v367_v15 = vmul.f32 %v3446_v10, %v3446_v10  ;;  %v333_v16 = vpop.f32.mrf.mxu1  ;;  %v2356_v61 = vor.u32 %v3060_v57, %v2355_v56  ;;  %v2336_v57 = vor.u32 %v3053_v49, %v2333_v50  ;;  %v3068_v62 = vld [vmem:[#allocation2 + $0x104] sm:$0xf0] }
 0x184   :  { %v356_v21 = vrot.slane %v355_v8, 1  ;;  %v371_v22 = vadd.f32 %v370_v9, %v369_v2  ;;  %v2357_v2 = vld [vmem:[#allocation2 + $0xc8] sm:$0xf0]  ;;  %653 = vmatpush.bf16.msrb.mxu0 %v2420_v1  ;;  %v2411_v16 = vld [vmem:[#allocation2 + $0x130] sm:$0xf] }
 0x185   :  { %v359_v26 = vadd.f32 %v358_v14, %v3446_v10  ;;  %v374_v27 = vrot.slane %v367_v15, 4  ;;  %640 = vmatpush.bf16.msra.mxu3 %v2356_v61  ;;  %v2360_v7 = vor.u32 %v3059_v63, %v2357_v2  ;;  %v2412_v19 = vor.u32 %v3074_v17, %v2411_v16  ;;  %v3051_v63 = vld [vmem:[#allocation2 + $0x84] sm:$0xf] }
 0x186   :  { %v357_v31 = vadd.f32 %v356_v21, %v355_v8  ;;  %v372_v32 = vrot.slane %v371_v22, 1  ;;  %v2424_v8 = vor.u32 %v3075_v3, %v2421_v4  ;;  %v2349_v21 = vld [vmem:[#allocation2 + $0xb8] sm:$0xf0]  ;;  %v3067_v3 = vld [vmem:[#allocation2 + $0x104] sm:$0xf] }
 0x187   :  { %v360_v36 = vrot.slane %v359_v26, 2  ;;  %v375_v37 = vadd.f32 %v374_v27, %v367_v15  ;;  %666 = vmatpush.bf16.msrb.mxu1 %v2360_v7  ;;  %v2348_v15 = vor.u32 %v3058_v12, %v2347_v11  ;;  %v2389_v4 = vld [vmem:[#allocation2 + $0x108] sm:$0xf0] }
 0x188   :  { %v3453_v41 = vmul.f32 %v357_v31, %v3422_v20  ;;  %v373_v42 = vadd.f32 %v372_v32, %v371_v22  ;;  %679 = vmatpush.bf16.msrb.mxu2 %v2424_v8  ;;  %v3073_v22 = vld [vmem:[#allocation2 + $0x134] sm:$0xf]  ;;  %654 = vmatpush.bf16.msrb.mxu0 %v2412_v19  ;;  %v2340_v32 = vor.u32 %v3056_v29, %v2339_v28 }
 0x189   :  { %v361_v47 = vadd.f32 %v360_v36, %v359_v26  ;;  %v376_v48 = vrot.slane %v375_v37, 2  ;;  %641 = vmatpush.bf16.msra.mxu3 %v2348_v15  ;;  %v2352_v26 = vor.u32 %v3057_v18, %v2349_v21  ;;  %v2416_v27 = vor.u32 %v3073_v22, %v2413_v23  ;;  %v349_v21 = vld [vmem:[#allocation7 + $0x1] ss:$8 sm:$0x3] }
 0x18a   :  { %v380_v51 = vmul.f32 %v373_v42, %v3422_v20  ;;  %v382_v52 = vmul.f32 %v3453_v41, %v3453_v41  ;;  %v346_v53 = vpop.f32.mrf.mxu2  ;;  %v2404_v36 = vor.u32 %v3072_v33, %v2403_v30  ;;  %v351_v30 = vld [vmem:[#allocation7 + $0x6] ss:$8 sm:$0x3] }
 0x18b   :  { %v362_v59 = vrot.slane %v361_v47, 1  ;;  %v377_v60 = vadd.f32 %v376_v48, %v375_v37  ;;  %667 = vmatpush.bf16.msrb.mxu1 %v2352_v26  ;;  %v2344_v37 = vor.u32 %v3055_v34, %v2341_v35  ;;  %v3070_v48 = vld [vmem:[#allocation2 + $0x114] sm:$0xf0]  ;;  %v2397_v53 = vld [vmem:[#allocation2 + $0x118] sm:$0xf0] }
 0x18c   :  { %v384_v0 = vsub.f32 %v380_v51, %v382_v52  ;;  %680 = vmatpush.bf16.msrb.mxu2 %v2416_v27  ;;  %655 = vmatpush.bf16.msrb.mxu0 %v2404_v36  ;;  %v3069_v52 = vld [vmem:[#allocation2 + $0x114] sm:$0xf]  ;;  %v2396_v56 = vor.u32 %v3070_v48, %v2395_v45 }
 0x18d   :  { %v363_v5 = vadd.f32 %v362_v59, %v361_v47  ;;  %v378_v6 = vrot.slane %v377_v60, 1  ;;  %642 = vmatpush.bf16.msra.mxu3 %v2340_v32  ;;  %v2332_v47 = vor.u32 %v3054_v44, %v2331_v40  ;;  %v2400_v58 = vor.u32 %v3069_v52, %v2397_v53  ;;  %v3052_v59 = vld [vmem:[#allocation2 + $0x84] sm:$0xf0] }
 0x18e   :  { %v3458_v9 = vadd.f32 0.8, %v384_v0  ;;  %v2324_v61 = vor.u32 %v3052_v59, %v2323_v55  ;;  %v2325_v0 = vld [vmem:[#allocation2 + $0x88] sm:$0xf0] }
 0x18f   :  { %v3461_v13 = vmul.f32 %v363_v5, %v3422_v20  ;;  %v379_v14 = vadd.f32 %v378_v6, %v377_v60  ;;  %668 = vmatpush.bf16.msrb.mxu1 %v2344_v37  ;;  %v2387_v60 = vld [vmem:[#allocation2 + $0x100] sm:$0xf]  ;;  %v2328_v5 = vor.u32 %v3051_v63, %v2325_v0  ;;  %v2392_v6 = vor.u32 %v3067_v3, %v2389_v4 }
 0x190   :  { %3240 = vrsqrt.f32 %v3458_v9  ;;  %681 = vmatpush.bf16.msrb.mxu2 %v2408_v43  ;;  %656 = vmatpush.bf16.msrb.mxu0 %v2396_v56  ;;  %v2388_v2 = vor.u32 %v3068_v62, %v2387_v60  ;;  %vm394_vm10 = vweird.f32 %v3458_v9 }
 0x191   :  { %v381_v24 = vmul.f32 %v379_v14, %v3422_v20  ;;  %v383_v25 = vmul.f32 %v3461_v13, %v3461_v13  ;;  %643 = vmatpush.bf16.msra.mxu3 %v2332_v47 }
 0x193   :  { %v385_v31 = vsub.f32 %v381_v24, %v383_v25  ;;  %669 = vmatpush.bf16.msrb.mxu1 %v2336_v57 }
 0x194   :  { %682 = vmatpush.bf16.msrb.mxu2 %v2400_v58  ;;  %657 = vmatpush.bf16.msrb.mxu0 %v2388_v2 }
 0x195   :  { %v387_v42 = vadd.f32 0.8, %v385_v31  ;;  %644 = vmatpush.bf16.msra.mxu3 %v2324_v61 }
 0x196   :  { %v3241_v46 = vpop.eup %3240 }
 0x197   :  { %v389_v51 = vmul.f32 %v3241_v46, %v3458_v9  ;;  %3242 = vrsqrt.f32 %v387_v42  ;;  %670 = vmatpush.bf16.msrb.mxu1 %v2328_v5  ;;  %vm395_vm7 = vweird.f32 %v3241_v46  ;;  %vm404_vm8 = vweird.f32 %v387_v42 }
 0x198   :  { %683 = vmatpush.bf16.msrb.mxu2 %v2392_v6  ;;  %vm396_vm12 = vmor %vm394_vm10, %vm395_vm7 }
 0x199   :  { %v390_v1 = vmul.f32 %v3241_v46, %v389_v51 }
 0x19b   :  { %v391_v8 = vmul.f32 0.5, %v390_v1 }
 0x19d   :  { %v3243_v7 = vpop.eup %3242  ;;  %v392_v14 = vsub.f32 1.5, %v391_v8 }
 0x19e   :  { %v399_v11 = vmul.f32 %v3243_v7, %v387_v42  ;;  %vm405_vm6 = vweird.f32 %v3243_v7 }
 0x19f   :  { %v393_v17 = vmul.f32 %v3241_v46, %v392_v14  ;;  %vm406_vm9 = vmor %vm404_vm8, %vm405_vm6 }
 0x1a0   :  { %v400_v12 = vmul.f32 %v3243_v7, %v399_v11 }
 0x1a1   :  { %v397_v23 = vsel %vm396_vm12, %v3241_v46, %v393_v17 }
 0x1a2   :  { %v401_v15 = vmul.f32 0.5, %v400_v12 }
 0x1a4   :  { %v402_v16 = vsub.f32 1.5, %v401_v15 }
 0x1a6   :  { %v403_v18 = vmul.f32 %v3243_v7, %v402_v16 }
 0x1a8   :  { %v407_v19 = vsel %vm406_vm9, %v3243_v7, %v403_v18 }
 0x1a9   :  { %v410_v22 = vrot.slane %v407_v19, 7 }
 0x1ab   :  { %v412_v24 = vsel %vm411_vm11, %v397_v23, %v410_v22 }
 0x1ac   :  { %v414_v25 = vmul.f32 %v412_v24, %v349_v21 }
 0x1ae   :  { %v417_v26 = vperm.slane %v414_v25, 1  ;;  %v416_v27 = vperm.slane %v414_v25, 0 }
 0x1b0   :  { %v421_v28 = vmul.f32 %v417_v26, %v3461_v13  ;;  %v420_v31 = vmul.f32 %v416_v27, %v3453_v41  ;;  %v429_v33 = vmul.f32 %v417_v26, %v3446_v10  ;;  %v428_v34 = vmul.f32 %v416_v27, %v3440_v54 }
 0x1b2   :  { %v424_v29 = vrot.slane %v421_v28, 7 }
 0x1b4   :  { %v425_v32 = vsel %vm411_vm11, %v420_v31, %v424_v29 }
 0x1b5   :  { %v427_v9 = vsub.f32 %v351_v30, %v425_v32 }
 0x1b7   :  { %v431_v35 = vperm.slane %v427_v9, 0  ;;  %v432_v36 = vperm.slane %v427_v9, 1 }
 0x1b9   :  { %v435_v37 = vadd.f32 %v431_v35, %v428_v34  ;;  %v436_v38 = vadd.f32 %v432_v36, %v429_v33 }
 0x1bb   :  { %vm437_vm13 = vcmp.gt.f32.partialorder %v435_v37, 0.0  ;;  %v439_v39 = vmul.f32 0.2, %v435_v37  ;;  %vm438_vm14 = vcmp.gt.f32.partialorder %v436_v38, 0.0  ;;  %v440_v40 = vmul.f32 0.2, %v436_v38 }
 0x1bd   :  { %v441_v13 = vsel %vm437_vm13, %v435_v37, %v439_v39  ;;  %v442_v42 = vsel %vm438_vm14, %v436_v38, %v440_v40 }
 0x1be   :  { %v475_v43 = vpack.c.bf16 %v441_v13, %v441_v13  ;;  %v476_v44 = vpack.c.bf16 %v442_v42, %v442_v42  ;;  %v690_v13 = vld [vmem:[#allocation7 + $0x2] ss:$8 sm:$0x3] }
 0x1c0   :  { %645 = vmatmul.bf16.vlgmr.msra.gmra.mxu3 %v475_v43  ;;  %658 = vmatmul.bf16.vlgmr.msrb.gmra.mxu0 %v476_v44 }
 0x1c1   :  { %671 = vmatmul.bf16.vlgmr.msrb.gmra.mxu1 %v475_v43  ;;  %684 = vmatmul.bf16.vlgmr.msrb.gmra.mxu2 %v476_v44 }
 0x23d   :  { %v659_v41 = vpop.f32.mrf.mxu0 }
 0x23e   :  { %v672_v10 = vpop.f32.mrf.mxu1 }
 0x243   :  { %v646_v45 = vpop.f32.mrf.mxu3 }
 0x244   :  { %v3475_v54 = vadd.f32 %v659_v41, %v646_v45  ;;  %v685_v46 = vpop.f32.mrf.mxu2 }
 0x245   :  { %v3477_v47 = vadd.f32 %v685_v46, %v672_v10  ;;  %v661_v48 = vpop.f32.mrf.mxu0 }
 0x246   :  { %v693_v49 = vrot.slane %v3475_v54, 4  ;;  %v707_v50 = vmul.f32 %v3475_v54, %v3475_v54  ;;  %v674_v51 = vpop.f32.mrf.mxu1  ;;  %v692_v48 = vld [vmem:[#allocation7 + $0x7] ss:$8 sm:$0x3] }
 0x247   :  { %v699_v52 = vrot.slane %v3477_v47, 4  ;;  %v708_v53 = vmul.f32 %v3477_v47, %v3477_v47 }
 0x248   :  { %v694_v55 = vadd.f32 %v693_v49, %v3475_v54  ;;  %v709_v56 = vrot.slane %v707_v50, 4 }
 0x249   :  { %v700_v57 = vadd.f32 %v699_v52, %v3477_v47  ;;  %v715_v58 = vrot.slane %v708_v53, 4 }
 0x24a   :  { %v695_v59 = vrot.slane %v694_v55, 2  ;;  %v710_v60 = vadd.f32 %v709_v56, %v707_v50 }
 0x24b   :  { %v701_v61 = vrot.slane %v700_v57, 2  ;;  %v716_v62 = vadd.f32 %v715_v58, %v708_v53  ;;  %v648_v63 = vpop.f32.mrf.mxu3 }
 0x24c   :  { %v696_v0 = vadd.f32 %v695_v59, %v694_v55  ;;  %v711_v1 = vrot.slane %v710_v60, 2  ;;  %v687_v2 = vpop.f32.mrf.mxu2 }
 0x24d   :  { %v702_v3 = vadd.f32 %v701_v61, %v700_v57  ;;  %v717_v4 = vrot.slane %v716_v62, 2 }
 0x24e   :  { %v697_v5 = vrot.slane %v696_v0, 1  ;;  %v712_v6 = vadd.f32 %v711_v1, %v710_v60 }
 0x24f   :  { %v703_v7 = vrot.slane %v702_v3, 1  ;;  %v718_v8 = vadd.f32 %v717_v4, %v716_v62 }
 0x250   :  { %v698_v11 = vadd.f32 %v697_v5, %v696_v0  ;;  %v713_v12 = vrot.slane %v712_v6, 1 }
 0x251   :  { %v704_v14 = vadd.f32 %v703_v7, %v702_v3  ;;  %v719_v15 = vrot.slane %v718_v8, 1 }
 0x252   :  { %v705_v16 = vmul.f32 %v698_v11, %v3422_v20  ;;  %v714_v17 = vadd.f32 %v713_v12, %v712_v6 }
 0x253   :  { %v706_v18 = vmul.f32 %v704_v14, %v3422_v20  ;;  %v720_v19 = vadd.f32 %v719_v15, %v718_v8 }
 0x254   :  { %v721_v21 = vmul.f32 %v714_v17, %v3422_v20  ;;  %v723_v22 = vmul.f32 %v705_v16, %v705_v16 }
 0x255   :  { %v722_v23 = vmul.f32 %v720_v19, %v3422_v20  ;;  %v724_v24 = vmul.f32 %v706_v18, %v706_v18 }
 0x256   :  { %v725_v25 = vsub.f32 %v721_v21, %v723_v22 }
 0x257   :  { %v726_v26 = vsub.f32 %v722_v23, %v724_v24 }
 0x258   :  { %v727_v27 = vadd.f32 0.8, %v725_v25 }
 0x259   :  { %v728_v28 = vadd.f32 0.8, %v726_v26 }
 0x25a   :  { %3244 = vrsqrt.f32 %v727_v27  ;;  %vm735_vm3 = vweird.f32 %v727_v27 }
 0x25b   :  { %3246 = vrsqrt.f32 %v728_v28  ;;  %vm745_vm1 = vweird.f32 %v728_v28 }
 0x260   :  { %v3245_v29 = vpop.eup %3244 }
 0x261   :  { %v3247_v30 = vpop.eup %3246  ;;  %v730_v31 = vmul.f32 %v3245_v29, %v727_v27  ;;  %vm736_vm0 = vweird.f32 %v3245_v29 }
 0x262   :  { %v740_v32 = vmul.f32 %v3247_v30, %v728_v28  ;;  %vm746_vm15 = vweird.f32 %v3247_v30  ;;  %vm737_vm4 = vmor %vm735_vm3, %vm736_vm0 }
 0x263   :  { %v731_v9 = vmul.f32 %v3245_v29, %v730_v31  ;;  %vm747_vm2 = vmor %vm745_vm1, %vm746_vm15 }
 0x264   :  { %v741_v33 = vmul.f32 %v3247_v30, %v740_v32 }
 0x265   :  { %v732_v34 = vmul.f32 0.5, %v731_v9 }
 0x266   :  { %v742_v35 = vmul.f32 0.5, %v741_v33 }
 0x267   :  { %v733_v36 = vsub.f32 1.5, %v732_v34 }
 0x268   :  { %v743_v37 = vsub.f32 1.5, %v742_v35 }
 0x269   :  { %v734_v38 = vmul.f32 %v3245_v29, %v733_v36 }
 0x26a   :  { %v744_v39 = vmul.f32 %v3247_v30, %v743_v37 }
 0x26b   :  { %v738_v43 = vsel %vm737_vm4, %v3245_v29, %v734_v38 }
 0x26c   :  { %v748_v40 = vsel %vm747_vm2, %v3247_v30, %v744_v39 }
 0x26d   :  { %v751_v42 = vrot.slane %v748_v40, 7 }
 0x26f   :  { %v752_v44 = vsel %vm411_vm11, %v738_v43, %v751_v42 }
 0x270   :  { %v754_v41 = vmul.f32 %v752_v44, %v690_v13 }
 0x272   :  { %v756_v10 = vperm.slane %v754_v41, 0  ;;  %v757_v45 = vperm.slane %v754_v41, 1 }
 0x274   :  { %v761_v46 = vmul.f32 %v757_v45, %v706_v18  ;;  %v760_v49 = vmul.f32 %v756_v10, %v705_v16  ;;  %v768_v53 = vmul.f32 %v756_v10, %v3475_v54  ;;  %v769_v55 = vmul.f32 %v757_v45, %v3477_v47 }
 0x276   :  { %v764_v50 = vrot.slane %v761_v46, 7 }
 0x278   :  { %v765_v51 = vsel %vm411_vm11, %v760_v49, %v764_v50 }
 0x279   :  { %v767_v52 = vsub.f32 %v692_v48, %v765_v51 }
 0x27b   :  { %v771_v56 = vperm.slane %v767_v52, 0  ;;  %v772_v57 = vperm.slane %v767_v52, 1 }
 0x27d   :  { %v775_v58 = vadd.f32 %v771_v56, %v768_v53  ;;  %v776_v59 = vadd.f32 %v772_v57, %v769_v55 }
 0x27f   :  { %vm777_vm5 = vcmp.gt.f32.partialorder %v775_v58, 0.0  ;;  %vm778_vm6 = vcmp.gt.f32.partialorder %v776_v59, 0.0  ;;  %v779_v60 = vmul.f32 0.2, %v775_v58  ;;  %v780_v61 = vmul.f32 0.2, %v776_v59 }
 0x281   :  { %v3495_v62 = vsel %vm777_vm5, %v775_v58, %v779_v60  ;;  %v3497_v63 = vsel %vm778_vm6, %v776_v59, %v780_v61 }
 0x282   :  { %3364 = dma.done.wait [#allocation4 + $0x1], 8192 }
 0x283   :  { %3365 = vsyncadd [#allocation4 + $0x1], 4294959104  ;;  %v2563_v0 = vld [vmem:[#allocation3 + $0xe0] sm:$0xf]  ;;  %v3113_v1 = vld [vmem:[#allocation3 + $0xec] sm:$0xf0] }
 0x284   :  { %v2691_v2 = vld [vmem:[#allocation3 + $0x1e0] sm:$0xf]  ;;  %v2564_v54 = vor.u32 %v3113_v1, %v2563_v0  ;;  %v3145_v3 = vld [vmem:[#allocation3 + $0x1ec] sm:$0xf0]  ;;  %v3111_v47 = vld [vmem:[#allocation3 + $0xe4] sm:$0xf] }
 0x285   :  { %v2565_v4 = vld [vmem:[#allocation3 + $0xf0] sm:$0xf0]  ;;  %v2692_v5 = vor.u32 %v3145_v3, %v2691_v2  ;;  %v3143_v7 = vld [vmem:[#allocation3 + $0x1e4] sm:$0xf]  ;;  %v2547_v11 = vld [vmem:[#allocation3 + $0xc0] sm:$0xf] }
 0x286   :  { %v2568_v6 = vor.u32 %v3111_v47, %v2565_v4  ;;  %v2693_v8 = vld [vmem:[#allocation3 + $0x1f0] sm:$0xf0]  ;;  %1173 = vmatpush.bf16.msrb.mxu3 %v2564_v54  ;;  %v3109_v14 = vld [vmem:[#allocation3 + $0xcc] sm:$0xf0]  ;;  %v2675_v15 = vld [vmem:[#allocation3 + $0x1c0] sm:$0xf] }
 0x287   :  { %v2696_v12 = vor.u32 %v3143_v7, %v2693_v8  ;;  %v3141_v16 = vld [vmem:[#allocation3 + $0x1cc] sm:$0xf0]  ;;  %1186 = vmatpush.bf16.msra.mxu0 %v2692_v5  ;;  %v2548_v17 = vor.u32 %v3109_v14, %v2547_v11  ;;  %v3107_v19 = vld [vmem:[#allocation3 + $0xc4] sm:$0xf]  ;;  %v2549_v21 = vld [vmem:[#allocation3 + $0xd0] sm:$0xf0] }
 0x288   :  { %1199 = vmatpush.bf16.msra.mxu1 %v2568_v6  ;;  %v2676_v18 = vor.u32 %v3141_v16, %v2675_v15  ;;  %v3139_v22 = vld [vmem:[#allocation3 + $0x1c4] sm:$0xf]  ;;  %v2552_v23 = vor.u32 %v3107_v19, %v2549_v21  ;;  %v2677_v24 = vld [vmem:[#allocation3 + $0x1d0] sm:$0xf0]  ;;  %v2531_v25 = vld [vmem:[#allocation3 + $0xa0] sm:$0xf] }
 0x289   :  { %1212 = vmatpush.bf16.msra.mxu2 %v2696_v12  ;;  %v3105_v26 = vld [vmem:[#allocation3 + $0xac] sm:$0xf0]  ;;  %v2680_v27 = vor.u32 %v3139_v22, %v2677_v24  ;;  %v2659_v28 = vld [vmem:[#allocation3 + $0x1a0] sm:$0xf]  ;;  %v3103_v30 = vld [vmem:[#allocation3 + $0xa4] sm:$0xf] }
 0x28a   :  { %v3137_v29 = vld [vmem:[#allocation3 + $0x1ac] sm:$0xf0]  ;;  %1174 = vmatpush.bf16.msrb.mxu3 %v2548_v17  ;;  %v2532_v31 = vor.u32 %v3105_v26, %v2531_v25  ;;  %v2533_v32 = vld [vmem:[#allocation3 + $0xb0] sm:$0xf0]  ;;  %v3135_v9 = vld [vmem:[#allocation3 + $0x1a4] sm:$0xf] }
 0x28b   :  { %v2661_v33 = vld [vmem:[#allocation3 + $0x1b0] sm:$0xf0]  ;;  %1187 = vmatpush.bf16.msra.mxu0 %v2676_v18  ;;  %v2660_v34 = vor.u32 %v3137_v29, %v2659_v28  ;;  %v2536_v35 = vor.u32 %v3103_v30, %v2533_v32  ;;  %v2515_v36 = vld [vmem:[#allocation3 + $0x80] sm:$0xf]  ;;  %v3101_v37 = vld [vmem:[#allocation3 + $0x8c] sm:$0xf0] }
 0x28c   :  { %1200 = vmatpush.bf16.msra.mxu1 %v2552_v23  ;;  %v2643_v38 = vld [vmem:[#allocation3 + $0x180] sm:$0xf]  ;;  %v2664_v39 = vor.u32 %v3135_v9, %v2661_v33  ;;  %v3133_v40 = vld [vmem:[#allocation3 + $0x18c] sm:$0xf0]  ;;  %v3099_v13 = vld [vmem:[#allocation3 + $0x84] sm:$0xf]  ;;  %v2516_v41 = vor.u32 %v3101_v37, %v2515_v36 }
 0x28d   :  { %1213 = vmatpush.bf16.msra.mxu2 %v2680_v27  ;;  %v2517_v42 = vld [vmem:[#allocation3 + $0x90] sm:$0xf0]  ;;  %v3131_v43 = vld [vmem:[#allocation3 + $0x184] sm:$0xf]  ;;  %v2644_v10 = vor.u32 %v3133_v40, %v2643_v38  ;;  %v2499_v46 = vld [vmem:[#allocation3 + $0x60] sm:$0xf] }
 0x28e   :  { %v2645_v44 = vld [vmem:[#allocation3 + $0x190] sm:$0xf0]  ;;  %1175 = vmatpush.bf16.msrb.mxu3 %v2532_v31  ;;  %v2520_v45 = vor.u32 %v3099_v13, %v2517_v42  ;;  %v3097_v48 = vld [vmem:[#allocation3 + $0x6c] sm:$0xf0]  ;;  %v2627_v49 = vld [vmem:[#allocation3 + $0x160] sm:$0xf] }
 0x28f   :  { %1188 = vmatpush.bf16.msra.mxu0 %v2660_v34  ;;  %v2648_v50 = vor.u32 %v3131_v43, %v2645_v44  ;;  %v3129_v51 = vld [vmem:[#allocation3 + $0x16c] sm:$0xf0]  ;;  %v3095_v52 = vld [vmem:[#allocation3 + $0x64] sm:$0xf]  ;;  %v2501_v53 = vld [vmem:[#allocation3 + $0x70] sm:$0xf0]  ;;  %v2500_v57 = vor.u32 %v3097_v48, %v2499_v46 }
 0x290   :  { %1201 = vmatpush.bf16.msra.mxu1 %v2536_v35  ;;  %v3127_v55 = vld [vmem:[#allocation3 + $0x164] sm:$0xf]  ;;  %v2629_v56 = vld [vmem:[#allocation3 + $0x170] sm:$0xf0]  ;;  %v2628_v58 = vor.u32 %v3129_v51, %v2627_v49  ;;  %v2504_v59 = vor.u32 %v3095_v52, %v2501_v53  ;;  %v2483_v60 = vld [vmem:[#allocation3 + $0x40] sm:$0xf] }
 0x291   :  { %1214 = vmatpush.bf16.msra.mxu2 %v2664_v39  ;;  %v3093_v61 = vld [vmem:[#allocation3 + $0x4c] sm:$0xf0]  ;;  %v2611_v0 = vld [vmem:[#allocation3 + $0x140] sm:$0xf]  ;;  %v2632_v1 = vor.u32 %v3127_v55, %v2629_v56  ;;  %v3091_v54 = vld [vmem:[#allocation3 + $0x44] sm:$0xf]  ;;  %v3505_v55 = vpack.c.bf16 %v3497_v63, %v3497_v63 }
 0x292   :  { %1176 = vmatpush.bf16.msrb.mxu3 %v2516_v41  ;;  %v3125_v2 = vld [vmem:[#allocation3 + $0x14c] sm:$0xf0]  ;;  %v2485_v3 = vld [vmem:[#allocation3 + $0x50] sm:$0xf0]  ;;  %v3123_v47 = vld [vmem:[#allocation3 + $0x144] sm:$0xf]  ;;  %v2484_v5 = vor.u32 %v3093_v61, %v2483_v60 }
 0x293   :  { %1189 = vmatpush.bf16.msra.mxu0 %v2644_v10  ;;  %v2613_v4 = vld [vmem:[#allocation3 + $0x150] sm:$0xf0]  ;;  %v2612_v6 = vor.u32 %v3125_v2, %v2611_v0  ;;  %v2488_v7 = vor.u32 %v3091_v54, %v2485_v3  ;;  %v2467_v8 = vld [vmem:[#allocation3 + $0x20] sm:$0xf]  ;;  %v3089_v11 = vld [vmem:[#allocation3 + $0x2c] sm:$0xf0] }
 0x294   :  { %1202 = vmatpush.bf16.msra.mxu1 %v2520_v45  ;;  %v2595_v12 = vld [vmem:[#allocation3 + $0x120] sm:$0xf]  ;;  %v2616_v14 = vor.u32 %v3123_v47, %v2613_v4  ;;  %v3121_v15 = vld [vmem:[#allocation3 + $0x12c] sm:$0xf0]  ;;  %v3087_v16 = vld [vmem:[#allocation3 + $0x24] sm:$0xf]  ;;  %v2468_v21 = vor.u32 %v3089_v11, %v2467_v8 }
 0x295   :  { %1215 = vmatpush.bf16.msra.mxu2 %v2648_v50  ;;  %v2469_v17 = vld [vmem:[#allocation3 + $0x30] sm:$0xf0]  ;;  %v3119_v18 = vld [vmem:[#allocation3 + $0x124] sm:$0xf]  ;;  %v2451_v22 = vld [vmem:[#allocation3] sm:$0xf]  ;;  %v2596_v24 = vor.u32 %v3121_v15, %v2595_v12  ;;  %v3501_v50 = vpack.c.bf16 %v3495_v62, %v3495_v62 }
 0x296   :  { %1177 = vmatpush.bf16.msrb.mxu3 %v2500_v57  ;;  %v2597_v19 = vld [vmem:[#allocation3 + $0x130] sm:$0xf0]  ;;  %v3085_v23 = vld [vmem:[#allocation3 + $0xc] sm:$0xf0]  ;;  %v2472_v25 = vor.u32 %v3087_v16, %v2469_v17  ;;  %v2579_v26 = vld [vmem:[#allocation3 + $0x100] sm:$0xf] }
 0x297   :  { %1190 = vmatpush.bf16.msra.mxu0 %v2628_v58  ;;  %v3117_v27 = vld [vmem:[#allocation3 + $0x10c] sm:$0xf0]  ;;  %v3083_v28 = vld [vmem:[#allocation3 + $0x4] sm:$0xf]  ;;  %v2600_v29 = vor.u32 %v3119_v18, %v2597_v19  ;;  %v2453_v30 = vld [vmem:[#allocation3 + $0x10] sm:$0xf0]  ;;  %v2452_v35 = vor.u32 %v3085_v23, %v2451_v22 }
 0x298   :  { %1203 = vmatpush.bf16.msra.mxu1 %v2504_v59  ;;  %v3115_v31 = vld [vmem:[#allocation3 + $0x104] sm:$0xf]  ;;  %v2581_v32 = vld [vmem:[#allocation3 + $0x110] sm:$0xf0]  ;;  %v2571_v9 = vld [vmem:[#allocation3 + $0xe8] sm:$0xf]  ;;  %v2580_v39 = vor.u32 %v3117_v27, %v2579_v26  ;;  %v2456_v40 = vor.u32 %v3083_v28, %v2453_v30 }
 0x299   :  { %1216 = vmatpush.bf16.msra.mxu2 %v2632_v1  ;;  %v3114_v33 = vld [vmem:[#allocation3 + $0xf4] sm:$0xf0]  ;;  %v2699_v34 = vld [vmem:[#allocation3 + $0x1e8] sm:$0xf]  ;;  %v3112_v37 = vld [vmem:[#allocation3 + $0xec] sm:$0xf]  ;;  %v2584_v43 = vor.u32 %v3115_v31, %v2581_v32 }
 0x29a   :  { %1178 = vmatpush.bf16.msrb.mxu3 %v2484_v5  ;;  %v3146_v36 = vld [vmem:[#allocation3 + $0x1f4] sm:$0xf0]  ;;  %v2573_v38 = vld [vmem:[#allocation3 + $0xf8] sm:$0xf0]  ;;  %v3144_v13 = vld [vmem:[#allocation3 + $0x1ec] sm:$0xf]  ;;  %v2572_v44 = vor.u32 %v3114_v33, %v2571_v9 }
 0x29b   :  { %1191 = vmatpush.bf16.msra.mxu0 %v2612_v6  ;;  %v2701_v42 = vld [vmem:[#allocation3 + $0x1f8] sm:$0xf0]  ;;  %v2700_v41 = vor.u32 %v3146_v36, %v2699_v34  ;;  %v2576_v10 = vor.u32 %v3112_v37, %v2573_v38  ;;  %v2555_v45 = vld [vmem:[#allocation3 + $0xc8] sm:$0xf]  ;;  %v3110_v46 = vld [vmem:[#allocation3 + $0xd4] sm:$0xf0] }
 0x29c   :  { %1204 = vmatpush.bf16.msra.mxu1 %v2488_v7  ;;  %v2683_v48 = vld [vmem:[#allocation3 + $0x1c8] sm:$0xf]  ;;  %v2704_v49 = vor.u32 %v3144_v13, %v2701_v42  ;;  %v3142_v51 = vld [vmem:[#allocation3 + $0x1d4] sm:$0xf0]  ;;  %v3108_v52 = vld [vmem:[#allocation3 + $0xcc] sm:$0xf]  ;;  %v2556_v58 = vor.u32 %v3110_v46, %v2555_v45 }
 0x29d   :  { %1217 = vmatpush.bf16.msra.mxu2 %v2616_v14  ;;  %v2557_v53 = vld [vmem:[#allocation3 + $0xd8] sm:$0xf0]  ;;  %v3140_v56 = vld [vmem:[#allocation3 + $0x1cc] sm:$0xf]  ;;  %v2684_v59 = vor.u32 %v3142_v51, %v2683_v48  ;;  %v2539_v62 = vld [vmem:[#allocation3 + $0xa8] sm:$0xf] }
 0x29e   :  { %1179 = vmatpush.bf16.msrb.mxu3 %v2468_v21  ;;  %v2685_v57 = vld [vmem:[#allocation3 + $0x1d8] sm:$0xf0]  ;;  %v2560_v60 = vor.u32 %v3108_v52, %v2557_v53  ;;  %v3106_v61 = vld [vmem:[#allocation3 + $0xb4] sm:$0xf0]  ;;  %v2667_v0 = vld [vmem:[#allocation3 + $0x1a8] sm:$0xf] }
 0x29f   :  { %1192 = vmatpush.bf16.msra.mxu0 %v2596_v24  ;;  %v2688_v1 = vor.u32 %v3140_v56, %v2685_v57  ;;  %v3138_v2 = vld [vmem:[#allocation3 + $0x1b4] sm:$0xf0]  ;;  %v3104_v54 = vld [vmem:[#allocation3 + $0xac] sm:$0xf]  ;;  %v2541_v63 = vld [vmem:[#allocation3 + $0xb8] sm:$0xf0]  ;;  %v2540_v4 = vor.u32 %v3106_v61, %v2539_v62 }
 0x2a0   :  { %1205 = vmatpush.bf16.msra.mxu1 %v2472_v25  ;;  %v3136_v3 = vld [vmem:[#allocation3 + $0x1ac] sm:$0xf]  ;;  %v2669_v47 = vld [vmem:[#allocation3 + $0x1b8] sm:$0xf0]  ;;  %v2668_v5 = vor.u32 %v3138_v2, %v2667_v0  ;;  %v2544_v6 = vor.u32 %v3104_v54, %v2541_v63  ;;  %v2523_v7 = vld [vmem:[#allocation3 + $0x88] sm:$0xf] }
 0x2a1   :  { %1218 = vmatpush.bf16.msra.mxu2 %v2600_v29  ;;  %v3102_v8 = vld [vmem:[#allocation3 + $0x94] sm:$0xf0]  ;;  %v2651_v11 = vld [vmem:[#allocation3 + $0x188] sm:$0xf]  ;;  %v2672_v12 = vor.u32 %v3136_v3, %v2669_v47  ;;  %v3100_v15 = vld [vmem:[#allocation3 + $0x8c] sm:$0xf] }
 0x2a2   :  { %1180 = vmatpush.bf16.msrb.mxu3 %v2452_v35  ;;  %v3134_v14 = vld [vmem:[#allocation3 + $0x194] sm:$0xf0]  ;;  %v2525_v16 = vld [vmem:[#allocation3 + $0x98] sm:$0xf0]  ;;  %v3132_v17 = vld [vmem:[#allocation3 + $0x18c] sm:$0xf]  ;;  %v2524_v19 = vor.u32 %v3102_v8, %v2523_v7 }
 0x2a3   :  { %1193 = vmatpush.bf16.msra.mxu0 %v2580_v39  ;;  %v2653_v18 = vld [vmem:[#allocation3 + $0x198] sm:$0xf0]  ;;  %v2652_v21 = vor.u32 %v3134_v14, %v2651_v11  ;;  %v2528_v22 = vor.u32 %v3100_v15, %v2525_v16  ;;  %v2507_v23 = vld [vmem:[#allocation3 + $0x68] sm:$0xf]  ;;  %v3098_v24 = vld [vmem:[#allocation3 + $0x74] sm:$0xf0] }
 0x2a4   :  { %1206 = vmatpush.bf16.msra.mxu1 %v2456_v40  ;;  %v2635_v25 = vld [vmem:[#allocation3 + $0x168] sm:$0xf]  ;;  %v2656_v26 = vor.u32 %v3132_v17, %v2653_v18  ;;  %v3130_v27 = vld [vmem:[#allocation3 + $0x174] sm:$0xf0]  ;;  %v3096_v28 = vld [vmem:[#allocation3 + $0x6c] sm:$0xf]  ;;  %v2508_v32 = vor.u32 %v3098_v24, %v2507_v23 }
 0x2a5   :  { %1219 = vmatpush.bf16.msra.mxu2 %v2584_v43  ;;  %1181 = vmatmul.bf16.vlgmr.msrb.gmra.mxu3 %v3501_v50  ;;  %v2509_v29 = vld [vmem:[#allocation3 + $0x78] sm:$0xf0]  ;;  %v3128_v30 = vld [vmem:[#allocation3 + $0x16c] sm:$0xf]  ;;  %v2636_v9 = vor.u32 %v3130_v27, %v2635_v25  ;;  %v2491_v34 = vld [vmem:[#allocation3 + $0x48] sm:$0xf] }
 0x2a6   :  { %1225 = vmatpush.bf16.msra.mxu3 %v2572_v44  ;;  %1194 = vmatmul.bf16.vlgmr.msra.gmra.mxu0 %v3505_v55  ;;  %v2637_v31 = vld [vmem:[#allocation3 + $0x178] sm:$0xf0]  ;;  %v2512_v33 = vor.u32 %v3096_v28, %v2509_v29  ;;  %v3094_v35 = vld [vmem:[#allocation3 + $0x54] sm:$0xf0]  ;;  %v2619_v36 = vld [vmem:[#allocation3 + $0x148] sm:$0xf] }
 0x2a7   :  { %1238 = vmatpush.bf16.msrb.mxu0 %v2700_v41  ;;  %1207 = vmatmul.bf16.vlgmr.msra.gmra.mxu1 %v3501_v50  ;;  %v2640_v37 = vor.u32 %v3128_v30, %v2637_v31  ;;  %v3126_v38 = vld [vmem:[#allocation3 + $0x154] sm:$0xf0]  ;;  %v3092_v39 = vld [vmem:[#allocation3 + $0x4c] sm:$0xf]  ;;  %v2493_v40 = vld [vmem:[#allocation3 + $0x58] sm:$0xf0]  ;;  %v2492_v43 = vor.u32 %v3094_v35, %v2491_v34 }
 0x2a8   :  { %1251 = vmatpush.bf16.msrb.mxu1 %v2576_v10  ;;  %1220 = vmatmul.bf16.vlgmr.msra.gmra.mxu2 %v3505_v55  ;;  %v3124_v13 = vld [vmem:[#allocation3 + $0x14c] sm:$0xf]  ;;  %v2621_v42 = vld [vmem:[#allocation3 + $0x158] sm:$0xf0]  ;;  %v2620_v44 = vor.u32 %v3126_v38, %v2619_v36  ;;  %v2496_v41 = vor.u32 %v3092_v39, %v2493_v40  ;;  %v2475_v10 = vld [vmem:[#allocation3 + $0x28] sm:$0xf] }
 0x2a9   :  { %1264 = vmatpush.bf16.msrb.mxu2 %v2704_v49  ;;  %v3090_v45 = vld [vmem:[#allocation3 + $0x34] sm:$0xf0]  ;;  %v2603_v46 = vld [vmem:[#allocation3 + $0x128] sm:$0xf]  ;;  %v2624_v48 = vor.u32 %v3124_v13, %v2621_v42  ;;  %v3088_v51 = vld [vmem:[#allocation3 + $0x2c] sm:$0xf] }
 0x2aa   :  { %1226 = vmatpush.bf16.msra.mxu3 %v2556_v58  ;;  %v3122_v49 = vld [vmem:[#allocation3 + $0x134] sm:$0xf0]  ;;  %v2477_v52 = vld [vmem:[#allocation3 + $0x38] sm:$0xf0]  ;;  %v3120_v53 = vld [vmem:[#allocation3 + $0x12c] sm:$0xf]  ;;  %v2476_v57 = vor.u32 %v3090_v45, %v2475_v10 }
 0x2ab   :  { %1239 = vmatpush.bf16.msrb.mxu0 %v2684_v59  ;;  %v2605_v56 = vld [vmem:[#allocation3 + $0x138] sm:$0xf0]  ;;  %v2604_v58 = vor.u32 %v3122_v49, %v2603_v46  ;;  %v2480_v59 = vor.u32 %v3088_v51, %v2477_v52  ;;  %v3086_v62 = vld [vmem:[#allocation3 + $0x14] sm:$0xf0]  ;;  %v2587_v61 = vld [vmem:[#allocation3 + $0x108] sm:$0xf] }
 0x2ac   :  { %1252 = vmatpush.bf16.msrb.mxu1 %v2560_v60  ;;  %v2459_v60 = vld [vmem:[#allocation3 + $0x8] sm:$0xf]  ;;  %v2608_v0 = vor.u32 %v3120_v53, %v2605_v56  ;;  %v3084_v2 = vld [vmem:[#allocation3 + $0xc] sm:$0xf]  ;;  %v2461_v54 = vld [vmem:[#allocation3 + $0x18] sm:$0xf0] }
 0x2ad   :  { %1265 = vmatpush.bf16.msrb.mxu2 %v2688_v1  ;;  %v3118_v1 = vld [vmem:[#allocation3 + $0x114] sm:$0xf0]  ;;  %v3116_v63 = vld [vmem:[#allocation3 + $0x10c] sm:$0xf]  ;;  %v2589_v3 = vld [vmem:[#allocation3 + $0x118] sm:$0xf0]  ;;  %v2460_v47 = vor.u32 %v3086_v62, %v2459_v60 }
 0x2ae   :  { %1227 = vmatpush.bf16.msra.mxu3 %v2540_v4  ;;  %v2588_v4 = vor.u32 %v3118_v1, %v2587_v61  ;;  %v3162_v10 = vld [vmem:[#allocation2 + $0x1f4] sm:$0xf0]  ;;  %v2827_v45 = vld [vmem:[#allocation2 + $0x270] sm:$0xf]  ;;  %v2755_v1 = vld [vmem:[#allocation2 + $0x1e0] sm:$0xf] }
 0x2af   :  { %1240 = vmatpush.bf16.msrb.mxu0 %v2668_v5  ;;  %v2464_v5 = vor.u32 %v3084_v2, %v2461_v54  ;;  %v2891_v49 = vld [vmem:[#allocation2 + $0x2f0] sm:$0xf]  ;;  %v3194_v53 = vld [vmem:[#allocation2 + $0x2f4] sm:$0xf0]  ;;  %v3160_v2 = vld [vmem:[#allocation2 + $0x1e4] sm:$0xf0] }
 0x2b0   :  { %1253 = vmatpush.bf16.msrb.mxu1 %v2544_v6  ;;  %v2592_v6 = vor.u32 %v3116_v63, %v2589_v3  ;;  %v2955_v56 = vld [vmem:[#allocation2 + $0x370] sm:$0xf]  ;;  %v3210_v60 = vld [vmem:[#allocation2 + $0x374] sm:$0xf0]  ;;  %v2819_v54 = vld [vmem:[#allocation2 + $0x260] sm:$0xf]  ;;  %v2756_v63 = vor.u32 %v3160_v2, %v2755_v1 }
 0x2b1   :  { %1266 = vmatpush.bf16.msrb.mxu2 %v2672_v12  ;;  %v3176_v3 = vld [vmem:[#allocation2 + $0x264] sm:$0xf0]  ;;  %vm1401_vm12 = vcmask 1042434   ;;  %vm1403_vm5 = vcmask 1041408  }
 0x2b2   :  { %1228 = vmatpush.bf16.msra.mxu3 %v2524_v19 }
 0x2b3   :  { %1241 = vmatpush.bf16.msrb.mxu0 %v2652_v21 }
 0x2b4   :  { %1254 = vmatpush.bf16.msrb.mxu1 %v2528_v22 }
 0x2b5   :  { %1267 = vmatpush.bf16.msrb.mxu2 %v2656_v26 }
 0x2b6   :  { %1229 = vmatpush.bf16.msra.mxu3 %v2508_v32 }
 0x2b7   :  { %1242 = vmatpush.bf16.msrb.mxu0 %v2636_v9 }
 0x2b8   :  { %1255 = vmatpush.bf16.msrb.mxu1 %v2512_v33 }
 0x2b9   :  { %1268 = vmatpush.bf16.msrb.mxu2 %v2640_v37 }
 0x2ba   :  { %1230 = vmatpush.bf16.msra.mxu3 %v2492_v43 }
 0x2bb   :  { %1243 = vmatpush.bf16.msrb.mxu0 %v2620_v44 }
 0x2bc   :  { %1256 = vmatpush.bf16.msrb.mxu1 %v2496_v41  ;;  %v2763_v41 = vld [vmem:[#allocation2 + $0x1f0] sm:$0xf] }
 0x2bd   :  { %1269 = vmatpush.bf16.msrb.mxu2 %v2624_v48  ;;  %v2764_v46 = vor.u32 %v3162_v10, %v2763_v41  ;;  %v3178_v48 = vld [vmem:[#allocation2 + $0x274] sm:$0xf0]  ;;  %v2867_v41 = vld [vmem:[#allocation2 + $0x2c0] sm:$0xf] }
 0x2be   :  { %1231 = vmatpush.bf16.msra.mxu3 %v2476_v57  ;;  %v2828_v52 = vor.u32 %v3178_v48, %v2827_v45  ;;  %v3188_v48 = vld [vmem:[#allocation2 + $0x2c4] sm:$0xf0] }
 0x2bf   :  { %1244 = vmatpush.bf16.msrb.mxu0 %v2604_v58 }
 0x2c0   :  { %1257 = vmatpush.bf16.msrb.mxu1 %v2480_v59  ;;  %v2892_v59 = vor.u32 %v3194_v53, %v2891_v49 }
 0x2c1   :  { %1270 = vmatpush.bf16.msrb.mxu2 %v2608_v0  ;;  %v2956_v0 = vor.u32 %v3210_v60, %v2955_v56  ;;  %v2868_v56 = vor.u32 %v3188_v48, %v2867_v41  ;;  %v2915_v41 = vld [vmem:[#allocation2 + $0x320] sm:$0xf] }
 0x2c2   :  { %1232 = vmatpush.bf16.msra.mxu3 %v2460_v47  ;;  %v2883_v47 = vld [vmem:[#allocation2 + $0x2e0] sm:$0xf] }
 0x2c3   :  { %1245 = vmatpush.bf16.msrb.mxu0 %v2588_v4  ;;  %v3192_v4 = vld [vmem:[#allocation2 + $0x2e4] sm:$0xf0] }
 0x2c4   :  { %1258 = vmatpush.bf16.msrb.mxu1 %v2464_v5  ;;  %v2820_v5 = vor.u32 %v3176_v3, %v2819_v54 }
 0x2c5   :  { %1271 = vmatpush.bf16.msrb.mxu2 %v2592_v6  ;;  %1233 = vmatmul.bf16.vlgmr.msra.gmra.mxu3 %v3501_v50  ;;  %v2884_v6 = vor.u32 %v3192_v4, %v2883_v47  ;;  %v2795_v47 = vld [vmem:[#allocation2 + $0x230] sm:$0xf]  ;;  %v3170_v4 = vld [vmem:[#allocation2 + $0x234] sm:$0xf0] }
 0x2c6   :  { %1246 = vmatmul.bf16.vlgmr.msrb.gmra.mxu0 %v3505_v55  ;;  %1849 = vmatpush.bf16.msrb.mxu3 %v2764_v46 }
 0x2c7   :  { %1259 = vmatmul.bf16.vlgmr.msrb.gmra.mxu1 %v3501_v50  ;;  %1862 = vmatpush.bf16.msra.mxu0 %v2828_v52 }
 0x2c8   :  { %1272 = vmatmul.bf16.vlgmr.msrb.gmra.mxu2 %v3505_v55  ;;  %1875 = vmatpush.bf16.msra.mxu1 %v2892_v59 }
 0x2c9   :  { %1888 = vmatpush.bf16.msra.mxu2 %v2956_v0  ;;  %v3154_v0 = vld [vmem:[#allocation2 + $0x1b4] sm:$0xf0] }
 0x2ca   :  { %1850 = vmatpush.bf16.msrb.mxu3 %v2756_v63 }
 0x2cb   :  { %1863 = vmatpush.bf16.msra.mxu0 %v2820_v5 }
 0x2cc   :  { %1876 = vmatpush.bf16.msra.mxu1 %v2884_v6 }
 0x323   :  { %v1195_v7 = vpop.f32.mrf.mxu0 }
 0x324   :  { %v1208_v8 = vpop.f32.mrf.mxu1 }
 0x328   :  { %v1182_v11 = vpop.f32.mrf.mxu3 }
 0x329   :  { %v3515_v12 = vadd.f32 %v1195_v7, %v1182_v11  ;;  %v2947_v7 = vld [vmem:[#allocation2 + $0x360] sm:$0xf] }
 0x32b   :  { %v1221_v14 = vpop.f32.mrf.mxu2  ;;  %v1281_v16 = vrot.slane %v3515_v12, 4  ;;  %v1309_v17 = vmul.f32 %v3515_v12, %v3515_v12  ;;  %v1197_v18 = vpop.f32.mrf.mxu0 }
 0x32c   :  { %v3517_v15 = vadd.f32 %v1221_v14, %v1208_v8  ;;  %v1210_v55 = vpop.f32.mrf.mxu1  ;;  %v3208_v8 = vld [vmem:[#allocation2 + $0x364] sm:$0xf0]  ;;  %v3158_v18 = vld [vmem:[#allocation2 + $0x1d4] sm:$0xf0] }
 0x32d   :  { %v1282_v23 = vadd.f32 %v1281_v16, %v3515_v12  ;;  %v1313_v24 = vrot.slane %v1309_v17, 4  ;;  %v2948_v16 = vor.u32 %v3208_v8, %v2947_v7 }
 0x32e   :  { %v1287_v19 = vrot.slane %v3517_v15, 4  ;;  %v1310_v50 = vmul.f32 %v3517_v15, %v3517_v15 }
 0x32f   :  { %v1283_v31 = vrot.slane %v1282_v23, 2  ;;  %v1314_v32 = vadd.f32 %v1313_v24, %v1309_v17  ;;  %v2747_v17 = vld [vmem:[#allocation2 + $0x1d0] sm:$0xf]  ;;  %1889 = vmatpush.bf16.msra.mxu2 %v2948_v16 }
 0x330   :  { %v1288_v21 = vadd.f32 %v1287_v19, %v3517_v15  ;;  %v1319_v22 = vrot.slane %v1310_v50, 4  ;;  %v1184_v27 = vpop.f32.mrf.mxu3  ;;  %v2811_v19 = vld [vmem:[#allocation2 + $0x250] sm:$0xf]  ;;  %v2748_v55 = vor.u32 %v3158_v18, %v2747_v17  ;;  %v2796_v17 = vor.u32 %v3170_v4, %v2795_v47 }
 0x331   :  { %v1284_v36 = vadd.f32 %v1283_v31, %v1282_v23  ;;  %v1315_v37 = vrot.slane %v1314_v32, 2  ;;  %v3190_v23 = vld [vmem:[#allocation2 + $0x2d4] sm:$0xf0]  ;;  %v2939_v27 = vld [vmem:[#allocation2 + $0x350] sm:$0xf] }
 0x332   :  { %v1289_v25 = vrot.slane %v1288_v21, 2  ;;  %v1320_v26 = vadd.f32 %v1319_v22, %v1310_v50  ;;  %v2875_v22 = vld [vmem:[#allocation2 + $0x2d0] sm:$0xf]  ;;  %1851 = vmatpush.bf16.msrb.mxu3 %v2748_v55 }
 0x333   :  { %v1223_v28 = vpop.f32.mrf.mxu2  ;;  %v1285_v42 = vrot.slane %v1284_v36, 1  ;;  %v1316_v43 = vadd.f32 %v1315_v37, %v1314_v32  ;;  %v2876_v32 = vor.u32 %v3190_v23, %v2875_v22  ;;  %v2859_v18 = vld [vmem:[#allocation2 + $0x2b0] sm:$0xf] }
 0x334   :  { %v1290_v29 = vadd.f32 %v1289_v25, %v1288_v21  ;;  %v1321_v30 = vrot.slane %v1320_v26, 2  ;;  %v3174_v21 = vld [vmem:[#allocation2 + $0x254] sm:$0xf0]  ;;  %v2923_v22 = vld [vmem:[#allocation2 + $0x330] sm:$0xf] }
 0x335   :  { %v1286_v57 = vadd.f32 %v1285_v42, %v1284_v36  ;;  %v1317_v58 = vrot.slane %v1316_v43, 1  ;;  %v3206_v28 = vld [vmem:[#allocation2 + $0x354] sm:$0xf0]  ;;  %1877 = vmatpush.bf16.msra.mxu1 %v2876_v32 }
 0x336   :  { %v1291_v9 = vrot.slane %v1290_v29, 1  ;;  %v1322_v33 = vadd.f32 %v1321_v30, %v1320_v26  ;;  %v2812_v26 = vor.u32 %v3174_v21, %v2811_v19  ;;  %v3186_v21 = vld [vmem:[#allocation2 + $0x2b4] sm:$0xf0] }
 0x337   :  { %v3537_v11 = vmul.f32 %v1286_v57, %v3422_v20  ;;  %v1318_v14 = vadd.f32 %v1317_v58, %v1316_v43  ;;  %v2803_v43 = vld [vmem:[#allocation2 + $0x240] sm:$0xf]  ;;  %v3204_v58 = vld [vmem:[#allocation2 + $0x344] sm:$0xf0] }
 0x338   :  { %v1292_v34 = vadd.f32 %v1291_v9, %v1290_v29  ;;  %v1323_v35 = vrot.slane %v1322_v33, 1  ;;  %v2940_v9 = vor.u32 %v3206_v28, %v2939_v27  ;;  %1864 = vmatpush.bf16.msra.mxu0 %v2812_v26  ;;  %v2931_v57 = vld [vmem:[#allocation2 + $0x340] sm:$0xf]  ;;  %v2860_v27 = vor.u32 %v3186_v21, %v2859_v18  ;;  %v3202_v28 = vld [vmem:[#allocation2 + $0x334] sm:$0xf0] }
 0x339   :  { %v1337_v29 = vmul.f32 %v1318_v14, %v3422_v20  ;;  %v1341_v30 = vmul.f32 %v3537_v11, %v3537_v11  ;;  %1878 = vmatpush.bf16.msra.mxu1 %v2868_v56  ;;  %v2932_v63 = vor.u32 %v3204_v58, %v2931_v57 }
 0x33a   :  { %v3528_v38 = vmul.f32 %v1292_v34, %v3422_v20  ;;  %v1324_v39 = vadd.f32 %v1323_v35, %v1322_v33  ;;  %1890 = vmatpush.bf16.msra.mxu2 %v2940_v9  ;;  %v3152_v9 = vld [vmem:[#allocation2 + $0x1a4] sm:$0xf0] }
 0x33b   :  { %v1345_v49 = vsub.f32 %v1337_v29, %v1341_v30  ;;  %v2723_v29 = vld [vmem:[#allocation2 + $0x1a0] sm:$0xf] }
 0x33c   :  { %v1338_v40 = vmul.f32 %v1324_v39, %v3422_v20  ;;  %v1342_v13 = vmul.f32 %v3528_v38, %v3528_v38  ;;  %v2739_v39 = vld [vmem:[#allocation2 + $0x1c0] sm:$0xf] }
 0x33d   :  { %v3559_v8 = vadd.f32 0.8, %v1345_v49  ;;  %1879 = vmatpush.bf16.msra.mxu1 %v2860_v27  ;;  %v3200_v49 = vld [vmem:[#allocation2 + $0x324] sm:$0xf0] }
 0x33e   :  { %v1346_v44 = vsub.f32 %v1338_v40, %v1342_v13  ;;  %v3156_v40 = vld [vmem:[#allocation2 + $0x1c4] sm:$0xf0]  ;;  %1891 = vmatpush.bf16.msra.mxu2 %v2932_v63  ;;  %v2916_v58 = vor.u32 %v3200_v49, %v2915_v41  ;;  %v2907_v63 = vld [vmem:[#allocation2 + $0x310] sm:$0xf] }
 0x33f   :  { %v2740_v42 = vor.u32 %v3156_v40, %v2739_v39  ;;  %v3168_v39 = vld [vmem:[#allocation2 + $0x224] sm:$0xf0]  ;;  %vm1359_vm13 = vweird.f32 %v3559_v8 }
 0x340   :  { %v3533_v51 = vadd.f32 0.8, %v1346_v44  ;;  %v3172_v44 = vld [vmem:[#allocation2 + $0x244] sm:$0xf0] }
 0x341   :  { %1852 = vmatpush.bf16.msrb.mxu3 %v2740_v42  ;;  %v2804_v53 = vor.u32 %v3172_v44, %v2803_v43  ;;  %v2851_v43 = vld [vmem:[#allocation2 + $0x2a0] sm:$0xf]  ;;  %v3184_v44 = vld [vmem:[#allocation2 + $0x2a4] sm:$0xf0] }
 0x342   :  { %3248 = vrsqrt.f32 %v3533_v51  ;;  %v2852_v48 = vor.u32 %v3184_v44, %v2851_v43  ;;  %v2893_v43 = vld [vmem:[#allocation2 + $0x2f8] sm:$0xf0]  ;;  %v3209_v44 = vld [vmem:[#allocation2 + $0x374] sm:$0xf]  ;;  %vm1369_vm7 = vweird.f32 %v3533_v51 }
 0x343   :  { %v1247_v62 = vpop.f32.mrf.mxu0  ;;  %1865 = vmatpush.bf16.msra.mxu0 %v2804_v53  ;;  %3250 = vrsqrt.f32 %v3559_v8 }
 0x344   :  { %v1260_v61 = vpop.f32.mrf.mxu1  ;;  %1880 = vmatpush.bf16.msra.mxu1 %v2852_v48  ;;  %v2757_v48 = vld [vmem:[#allocation2 + $0x1e8] sm:$0xf0] }
 0x347   :  { %1866 = vmatpush.bf16.msra.mxu0 %v2796_v17 }
 0x348   :  { %v1234_v50 = vpop.f32.mrf.mxu3  ;;  %v3539_v24 = vpop.eup %3248 }
 0x349   :  { %v3541_v25 = vadd.f32 %v1247_v62, %v1234_v50  ;;  %v1364_v13 = vmul.f32 %v3539_v24, %v3533_v51  ;;  %vm1370_vm8 = vweird.f32 %v3539_v24 }
 0x34a   :  { %vm3602_vm9 = vmor %vm1369_vm7, %vm1370_vm8 }
 0x34b   :  { %v1273_v31 = vpop.f32.mrf.mxu2  ;;  %v1293_v33 = vrot.slane %v3541_v25, 4  ;;  %v1311_v34 = vmul.f32 %v3541_v25, %v3541_v25  ;;  %v1249_v36 = vpop.f32.mrf.mxu0  ;;  %v1365_v1 = vmul.f32 %v3539_v24, %v1364_v13 }
 0x34c   :  { %v3549_v35 = vadd.f32 %v1273_v31, %v1260_v61  ;;  %v1262_v37 = vpop.f32.mrf.mxu1  ;;  %v2731_v61 = vld [vmem:[#allocation2 + $0x1b0] sm:$0xf]  ;;  %v2724_v36 = vor.u32 %v3152_v9, %v2723_v29 }
 0x34d   :  { %v1294_v10 = vadd.f32 %v1293_v33, %v3541_v25  ;;  %v1325_v45 = vrot.slane %v1311_v34, 4  ;;  %v2732_v3 = vor.u32 %v3154_v0, %v2731_v61  ;;  %v3561_v23 = vmul.f32 0.5, %v1365_v1  ;;  %v2787_v37 = vld [vmem:[#allocation2 + $0x220] sm:$0xf] }
 0x34e   :  { %v1299_v46 = vrot.slane %v3549_v35, 4  ;;  %v1312_v52 = vmul.f32 %v3549_v35, %v3549_v35 }
 0x34f   :  { %v1295_v59 = vrot.slane %v1294_v10, 2  ;;  %v1326_v60 = vadd.f32 %v1325_v45, %v1311_v34  ;;  %1853 = vmatpush.bf16.msrb.mxu3 %v2732_v3  ;;  %v2924_v34 = vor.u32 %v3202_v28, %v2923_v22  ;;  %v3180_v22 = vld [vmem:[#allocation2 + $0x284] sm:$0xf0] }
 0x350   :  { %v1300_v62 = vadd.f32 %v1299_v46, %v3549_v35  ;;  %v1331_v2 = vrot.slane %v1312_v52, 4  ;;  %v1236_v54 = vpop.f32.mrf.mxu3  ;;  %v2788_v46 = vor.u32 %v3168_v39, %v2787_v37  ;;  %v3193_v37 = vld [vmem:[#allocation2 + $0x2f4] sm:$0xf] }
 0x351   :  { %v1296_v5 = vadd.f32 %v1295_v59, %v1294_v10  ;;  %v1327_v6 = vrot.slane %v1326_v60, 2  ;;  %v1367_v10 = vsub.f32 1.5, %v3561_v23  ;;  %1892 = vmatpush.bf16.msra.mxu2 %v2924_v34  ;;  %v3150_v59 = vld [vmem:[#allocation2 + $0x194] sm:$0xf0]  ;;  %v3177_v34 = vld [vmem:[#allocation2 + $0x274] sm:$0xf]  ;;  %v2896_v41 = vor.u32 %v3193_v37, %v2893_v43 }
 0x352   :  { %v1301_v7 = vrot.slane %v1300_v62, 2  ;;  %v1332_v14 = vadd.f32 %v1331_v2, %v1312_v52  ;;  %v2715_v52 = vld [vmem:[#allocation2 + $0x190] sm:$0xf]  ;;  %1867 = vmatpush.bf16.msra.mxu0 %v2788_v46  ;;  %v3182_v54 = vld [vmem:[#allocation2 + $0x294] sm:$0xf0] }
 0x353   :  { %v1275_v16 = vpop.f32.mrf.mxu2  ;;  %v1297_v19 = vrot.slane %v1296_v5, 1  ;;  %v1328_v50 = vadd.f32 %v1327_v6, %v1326_v60  ;;  %1854 = vmatpush.bf16.msrb.mxu3 %v2724_v36  ;;  %v2779_v60 = vld [vmem:[#allocation2 + $0x210] sm:$0xf]  ;;  %v2716_v0 = vor.u32 %v3150_v59, %v2715_v52  ;;  %v2707_v6 = vld [vmem:[#allocation2 + $0x180] sm:$0xf] }
 0x354   :  { %v1302_v55 = vadd.f32 %v1301_v7, %v1300_v62  ;;  %v1333_v26 = vrot.slane %v1332_v14, 2  ;;  %v3166_v62 = vld [vmem:[#allocation2 + $0x214] sm:$0xf0]  ;;  %v2843_v2 = vld [vmem:[#allocation2 + $0x290] sm:$0xf] }
 0x355   :  { %v1298_v30 = vadd.f32 %v1297_v19, %v1296_v5  ;;  %v1329_v31 = vrot.slane %v1328_v50, 1  ;;  %v2780_v1 = vor.u32 %v3166_v62, %v2779_v60  ;;  %v2844_v4 = vor.u32 %v3182_v54, %v2843_v2  ;;  %v3198_v5 = vld [vmem:[#allocation2 + $0x314] sm:$0xf0]  ;;  %v3148_v7 = vld [vmem:[#allocation2 + $0x184] sm:$0xf0]  ;;  %1893 = vmatpush.bf16.msra.mxu2 %v2916_v58 }
 0x356   :  { %v1303_v32 = vrot.slane %v1302_v55, 1  ;;  %v1334_v33 = vadd.f32 %v1333_v26, %v1332_v14  ;;  %v3576_v14 = vpop.eup %3250  ;;  %v2908_v17 = vor.u32 %v3198_v5, %v2907_v63  ;;  %v2708_v18 = vor.u32 %v3148_v7, %v2707_v6  ;;  %v2771_v19 = vld [vmem:[#allocation2 + $0x200] sm:$0xf]  ;;  %v2829_v36 = vld [vmem:[#allocation2 + $0x278] sm:$0xf0] }
 0x357   :  { %v3565_v40 = vmul.f32 %v1298_v30, %v3422_v20  ;;  %v1330_v13 = vadd.f32 %v1329_v31, %v1328_v50  ;;  %1855 = vmatpush.bf16.msrb.mxu3 %v2716_v0  ;;  %v3164_v50 = vld [vmem:[#allocation2 + $0x204] sm:$0xf0]  ;;  %v2899_v26 = vld [vmem:[#allocation2 + $0x300] sm:$0xf]  ;;  %1868 = vmatpush.bf16.msra.mxu0 %v2780_v1  ;;  %v3161_v31 = vld [vmem:[#allocation2 + $0x1f4] sm:$0xf]  ;;  %v1354_v9 = vmul.f32 %v3576_v14, %v3559_v8  ;;  %vm1360_vm1 = vweird.f32 %v3576_v14 }
 0x358   :  { %v1304_v42 = vadd.f32 %v1303_v32, %v1302_v55  ;;  %v1335_v45 = vrot.slane %v1334_v33, 1  ;;  %v2835_v55 = vld [vmem:[#allocation2 + $0x280] sm:$0xf]  ;;  %1881 = vmatpush.bf16.msra.mxu1 %v2844_v4  ;;  %v2772_v28 = vor.u32 %v3164_v50, %v2771_v19  ;;  %v3196_v30 = vld [vmem:[#allocation2 + $0x304] sm:$0xf0]  ;;  %vm1361_vm4 = vmor %vm1359_vm13, %vm1360_vm1 }
 0x359   :  { %v1339_v53 = vmul.f32 %v1330_v13, %v3422_v20  ;;  %v1343_v56 = vmul.f32 %v3565_v40, %v3565_v40  ;;  %v2836_v29 = vor.u32 %v3180_v22, %v2835_v55  ;;  %v2765_v32 = vld [vmem:[#allocation2 + $0x1f8] sm:$0xf0]  ;;  %1894 = vmatpush.bf16.msra.mxu2 %v2908_v17  ;;  %v2900_v13 = vor.u32 %v3196_v30, %v2899_v26  ;;  %v3159_v46 = vld [vmem:[#allocation2 + $0x1e4] sm:$0xf]  ;;  %v2885_v62 = vld [vmem:[#allocation2 + $0x2e8] sm:$0xf0] }
 0x35a   :  { %v3572_v57 = vmul.f32 %v1304_v42, %v3422_v20  ;;  %v1336_v61 = vadd.f32 %v1335_v45, %v1334_v33  ;;  %v2768_v33 = vor.u32 %v3161_v31, %v2765_v32  ;;  %v2832_v42 = vor.u32 %v3177_v34, %v2829_v36  ;;  %v2957_v45 = vld [vmem:[#allocation2 + $0x378] sm:$0xf0]  ;;  %v3191_v58 = vld [vmem:[#allocation2 + $0x2e4] sm:$0xf]  ;;  %v2949_v0 = vld [vmem:[#allocation2 + $0x368] sm:$0xf0] }
 0x35b   :  { %v1347_v3 = vsub.f32 %v1339_v53, %v1343_v56  ;;  %1856 = vmatpush.bf16.msrb.mxu3 %v2708_v18  ;;  %1869 = vmatpush.bf16.msra.mxu0 %v2772_v28  ;;  %v2960_v49 = vor.u32 %v3209_v44, %v2957_v45  ;;  %v2760_v52 = vor.u32 %v3159_v46, %v2757_v48  ;;  %v3175_v53 = vld [vmem:[#allocation2 + $0x264] sm:$0xf]  ;;  %v2821_v56 = vld [vmem:[#allocation2 + $0x268] sm:$0xf0]  ;;  %v3157_v2 = vld [vmem:[#allocation2 + $0x1d4] sm:$0xf] }
 0x35c   :  { %v1344_v47 = vmul.f32 %v3572_v57, %v3572_v57  ;;  %v1340_v16 = vmul.f32 %v1336_v61, %v3422_v20  ;;  %1882 = vmatpush.bf16.msra.mxu1 %v2836_v29  ;;  %v1355_v59 = vmul.f32 %v3576_v14, %v1354_v9  ;;  %v2824_v60 = vor.u32 %v3175_v53, %v2821_v56  ;;  %v3207_v61 = vld [vmem:[#allocation2 + $0x364] sm:$0xf]  ;;  %v2749_v54 = vld [vmem:[#allocation2 + $0x1d8] sm:$0xf0]  ;;  %v3173_v63 = vld [vmem:[#allocation2 + $0x254] sm:$0xf] }
 0x35d   :  { %v3579_v21 = vadd.f32 0.8, %v1347_v3  ;;  %1895 = vmatpush.bf16.msra.mxu2 %v2900_v13  ;;  %v2888_v1 = vor.u32 %v3191_v58, %v2885_v62  ;;  %v2752_v4 = vor.u32 %v3157_v2, %v2749_v54  ;;  %v2813_v5 = vld [vmem:[#allocation2 + $0x258] sm:$0xf0]  ;;  %v3189_v6 = vld [vmem:[#allocation2 + $0x2d4] sm:$0xf]  ;;  %v1368_v29 = vmul.f32 %v3539_v24, %v1367_v10 }
 0x35e   :  { %v1348_v27 = vsub.f32 %v1340_v16, %v1344_v47  ;;  %v2952_v47 = vor.u32 %v3207_v61, %v2949_v0  ;;  %v2877_v7 = vld [vmem:[#allocation2 + $0x2d8] sm:$0xf0]  ;;  %v3205_v17 = vld [vmem:[#allocation2 + $0x354] sm:$0xf]  ;;  %v3155_v19 = vld [vmem:[#allocation2 + $0x1c4] sm:$0xf]  ;;  %v2816_v55 = vor.u32 %v3173_v63, %v2813_v5 }
 0x35f   :  { %3252 = vrsqrt.f32 %v3579_v21  ;;  %1901 = vmatpush.bf16.msra.mxu3 %v2768_v33  ;;  %1914 = vmatpush.bf16.msrb.mxu0 %v2832_v42  ;;  %v2941_v18 = vld [vmem:[#allocation2 + $0x358] sm:$0xf0]  ;;  %v1356_v50 = vmul.f32 0.5, %v1355_v59  ;;  %v2880_v22 = vor.u32 %v3189_v6, %v2877_v7  ;;  %v2741_v26 = vld [vmem:[#allocation2 + $0x1c8] sm:$0xf0]  ;;  %v1372_v45 = vsel %vm3602_vm9, %v3539_v24, %v1368_v29 }
 0x360   :  { %v3584_v39 = vadd.f32 0.8, %v1348_v27  ;;  %1927 = vmatpush.bf16.msrb.mxu1 %v2896_v41  ;;  %v3171_v27 = vld [vmem:[#allocation2 + $0x244] sm:$0xf]  ;;  %v2805_v31 = vld [vmem:[#allocation2 + $0x248] sm:$0xf0]  ;;  %v2944_v34 = vor.u32 %v3205_v17, %v2941_v18  ;;  %v2744_v36 = vor.u32 %v3155_v19, %v2741_v26  ;;  %vm1379_vm14 = vweird.f32 %v3579_v21 }
 0x361   :  { %1940 = vmatpush.bf16.msrb.mxu2 %v2960_v49  ;;  %v3187_v32 = vld [vmem:[#allocation2 + $0x2c4] sm:$0xf]  ;;  %v2869_v9 = vld [vmem:[#allocation2 + $0x2c8] sm:$0xf0]  ;;  %v2808_v42 = vor.u32 %v3171_v27, %v2805_v31  ;;  %v1357_v44 = vsub.f32 1.5, %v1356_v50 }
 0x362   :  { %3254 = vrsqrt.f32 %v3584_v39  ;;  %v3203_v23 = vld [vmem:[#allocation2 + $0x344] sm:$0xf]  ;;  %v2933_v13 = vld [vmem:[#allocation2 + $0x348] sm:$0xf0]  ;;  %v2872_v43 = vor.u32 %v3187_v32, %v2869_v9  ;;  %v3153_v46 = vld [vmem:[#allocation2 + $0x1b4] sm:$0xf]  ;;  %vm1389_vm2 = vweird.f32 %v3584_v39 }
 0x363   :  { %1902 = vmatpush.bf16.msra.mxu3 %v2760_v52  ;;  %1915 = vmatpush.bf16.msrb.mxu0 %v2824_v60  ;;  %v2733_v48 = vld [vmem:[#allocation2 + $0x1b8] sm:$0xf0]  ;;  %v2936_v52 = vor.u32 %v3203_v23, %v2933_v13  ;;  %v3169_v56 = vld [vmem:[#allocation2 + $0x234] sm:$0xf]  ;;  %v2725_v5 = vld [vmem:[#allocation2 + $0x1a8] sm:$0xf0] }
 0x364   :  { %1928 = vmatpush.bf16.msrb.mxu1 %v2888_v1  ;;  %v2736_v53 = vor.u32 %v3153_v46, %v2733_v48  ;;  %v2797_v58 = vld [vmem:[#allocation2 + $0x238] sm:$0xf0]  ;;  %v3185_v60 = vld [vmem:[#allocation2 + $0x2b4] sm:$0xf]  ;;  %v1397_v1 = vrot.slane %v1372_v45, 7 }
 0x365   :  { %v3588_v3 = vpop.eup %3252  ;;  %1941 = vmatpush.bf16.msrb.mxu2 %v2952_v47  ;;  %v2861_v24 = vld [vmem:[#allocation2 + $0x2b8] sm:$0xf0]  ;;  %v3201_v62 = vld [vmem:[#allocation2 + $0x334] sm:$0xf]  ;;  %v2800_v2 = vor.u32 %v3169_v56, %v2797_v58  ;;  %v3151_v47 = vld [vmem:[#allocation2 + $0x1a4] sm:$0xf] }
 0x366   :  { %v1374_v16 = vmul.f32 %v3588_v3, %v3579_v21  ;;  %vm1380_vm10 = vweird.f32 %v3588_v3  ;;  %v2864_v54 = vor.u32 %v3185_v60, %v2861_v24  ;;  %v2925_v63 = vld [vmem:[#allocation2 + $0x338] sm:$0xf0]  ;;  %v1358_v21 = vmul.f32 %v3576_v14, %v1357_v44  ;;  %v3167_v6 = vld [vmem:[#allocation2 + $0x224] sm:$0xf]  ;;  %v2789_v7 = vld [vmem:[#allocation2 + $0x228] sm:$0xf0] }
 0x367   :  { %1903 = vmatpush.bf16.msra.mxu3 %v2752_v4  ;;  %1916 = vmatpush.bf16.msrb.mxu0 %v2816_v55  ;;  %vm3617_vm0 = vmor %vm1379_vm14, %vm1380_vm10  ;;  %v2928_v19 = vor.u32 %v3201_v62, %v2925_v63  ;;  %v2728_v50 = vor.u32 %v3151_v47, %v2725_v5  ;;  %v3183_v55 = vld [vmem:[#allocation2 + $0x2a4] sm:$0xf]  ;;  %v3149_v26 = vld [vmem:[#allocation2 + $0x194] sm:$0xf]  ;;  %v2792_v29 = vor.u32 %v3167_v6, %v2789_v7 }
 0x368   :  { %v3592_v28 = vpop.eup %3254  ;;  %v1375_v30 = vmul.f32 %v3588_v3, %v1374_v16  ;;  %1929 = vmatpush.bf16.msrb.mxu1 %v2880_v22  ;;  %v3199_v22 = vld [vmem:[#allocation2 + $0x324] sm:$0xf]  ;;  %v2717_v31 = vld [vmem:[#allocation2 + $0x198] sm:$0xf0]  ;;  %v3165_v32 = vld [vmem:[#allocation2 + $0x214] sm:$0xf]  ;;  %v1362_v23 = vsel %vm1361_vm4, %v3576_v14, %v1358_v21 }
 0x369   :  { %v1384_v33 = vmul.f32 %v3592_v28, %v3584_v39  ;;  %1942 = vmatpush.bf16.msrb.mxu2 %v2944_v34  ;;  %vm1390_vm15 = vweird.f32 %v3592_v28  ;;  %v2917_v39 = vld [vmem:[#allocation2 + $0x328] sm:$0xf0]  ;;  %v2781_v9 = vld [vmem:[#allocation2 + $0x218] sm:$0xf0]  ;;  %v3181_v34 = vld [vmem:[#allocation2 + $0x294] sm:$0xf]  ;;  %v2720_v13 = vor.u32 %v3149_v26, %v2717_v31 }
 0x36a   :  { %v1376_v37 = vmul.f32 0.5, %v1375_v30  ;;  %vm3630_vm3 = vmor %vm1389_vm2, %vm1390_vm15  ;;  %v3197_v10 = vld [vmem:[#allocation2 + $0x314] sm:$0xf]  ;;  %v3147_v44 = vld [vmem:[#allocation2 + $0x184] sm:$0xf]  ;;  %v2784_v45 = vor.u32 %v3165_v32, %v2781_v9 }
 0x36b   :  { %v1385_v51 = vmul.f32 %v3592_v28, %v1384_v33  ;;  %1904 = vmatpush.bf16.msra.mxu3 %v2744_v36  ;;  %1917 = vmatpush.bf16.msrb.mxu0 %v2808_v42  ;;  %v2845_v36 = vld [vmem:[#allocation2 + $0x298] sm:$0xf0]  ;;  %v2709_v8 = vld [vmem:[#allocation2 + $0x188] sm:$0xf0]  ;;  %v3163_v48 = vld [vmem:[#allocation2 + $0x204] sm:$0xf] }
 0x36c   :  { %v1377_v41 = vsub.f32 1.5, %v1376_v37  ;;  %1930 = vmatpush.bf16.msrb.mxu1 %v2872_v43  ;;  %v1278_v37 = vld [vmem:[#allocation7 + $0x3] ss:$8 sm:$0xf]  ;;  %v2909_v43 = vld [vmem:[#allocation2 + $0x318] sm:$0xf0]  ;;  %v2848_v46 = vor.u32 %v3181_v34, %v2845_v36  ;;  %v2712_v58 = vor.u32 %v3147_v44, %v2709_v8 }
 0x36d   :  { %v1386_v49 = vmul.f32 0.5, %v1385_v51  ;;  %1943 = vmatpush.bf16.msrb.mxu2 %v2936_v52  ;;  %v1400_v51 = vsel %vm411_vm11, %v1362_v23, %v1397_v1  ;;  %v3179_v52 = vld [vmem:[#allocation2 + $0x284] sm:$0xf]  ;;  %v2912_v56 = vor.u32 %v3197_v10, %v2909_v43 }
 0x36e   :  { %v1378_v59 = vmul.f32 %v3588_v3, %v1377_v41 }
 0x36f   :  { %v1387_v0 = vsub.f32 1.5, %v1386_v49  ;;  %1905 = vmatpush.bf16.msra.mxu3 %v2736_v53  ;;  %1918 = vmatpush.bf16.msrb.mxu0 %v2800_v2  ;;  %v2773_v49 = vld [vmem:[#allocation2 + $0x208] sm:$0xf0] }
 0x370   :  { %v1382_v4 = vsel %vm3617_vm0, %v3588_v3, %v1378_v59  ;;  %v2853_v3 = vld [vmem:[#allocation2 + $0x2a8] sm:$0xf0]  ;;  %1931 = vmatpush.bf16.msrb.mxu1 %v2864_v54  ;;  %v3195_v59 = vld [vmem:[#allocation2 + $0x304] sm:$0xf]  ;;  %v2776_v1 = vor.u32 %v3163_v48, %v2773_v49 }
 0x371   :  { %v1398_v16 = vrot.slane %v1382_v4, 6  ;;  %v1388_v17 = vmul.f32 %v3592_v28, %v1387_v0  ;;  %v2856_v30 = vor.u32 %v3183_v55, %v2853_v3  ;;  %1944 = vmatpush.bf16.msrb.mxu2 %v2928_v19  ;;  %v2837_v53 = vld [vmem:[#allocation2 + $0x288] sm:$0xf0] }
 0x372   :  { %v2901_v0 = vld [vmem:[#allocation2 + $0x308] sm:$0xf0]  ;;  %v2840_v2 = vor.u32 %v3179_v52, %v2837_v53 }
 0x373   :  { %v1392_v27 = vsel %vm3630_vm3, %v3592_v28, %v1388_v17  ;;  %1906 = vmatpush.bf16.msra.mxu3 %v2728_v50  ;;  %v2920_v28 = vor.u32 %v3199_v22, %v2917_v39  ;;  %1919 = vmatpush.bf16.msrb.mxu0 %v2792_v29  ;;  %v2904_v21 = vor.u32 %v3195_v59, %v2901_v0 }
 0x374   :  { %v1399_v33 = vrot.slane %v1392_v27, 5  ;;  %1932 = vmatpush.bf16.msrb.mxu1 %v2856_v30 }
 0x375   :  { %1945 = vmatpush.bf16.msrb.mxu2 %v2920_v28 }
 0x376   :  { %v1402_v42 = vsel %vm1401_vm12, %v1398_v16, %v1399_v33  ;;  %v1280_v16 = vld [vmem:[#allocation7 + $0x20] ss:$8 sm:$0xf] }
 0x377   :  { %v1404_v41 = vsel %vm1403_vm5, %v1400_v51, %v1402_v42  ;;  %1907 = vmatpush.bf16.msra.mxu3 %v2720_v13  ;;  %1920 = vmatpush.bf16.msrb.mxu0 %v2784_v45 }
 0x378   :  { %v1406_v14 = vmul.f32 %v1404_v41, %v1278_v37  ;;  %1933 = vmatpush.bf16.msrb.mxu1 %v2848_v46 }
 0x379   :  { %1946 = vmatpush.bf16.msrb.mxu2 %v2912_v56 }
 0x37a   :  { %v1408_v60 = vperm.slane %v1406_v14, 0  ;;  %v1409_v24 = vperm.slane %v1406_v14, 1  ;;  %v1410_v62 = vperm.slane %v1406_v14, 2  ;;  %v1411_v61 = vperm.slane %v1406_v14, 3 }
 0x37b   :  { %1908 = vmatpush.bf16.msra.mxu3 %v2712_v58  ;;  %1921 = vmatpush.bf16.msrb.mxu0 %v2776_v1 }
 0x37c   :  { %v1417_v54 = vmul.f32 %v1409_v24, %v3528_v38  ;;  %v1418_v63 = vmul.f32 %v1410_v62, %v3565_v40  ;;  %v1419_v47 = vmul.f32 %v1411_v61, %v3572_v57  ;;  %v1416_v4 = vmul.f32 %v1408_v60, %v3537_v11  ;;  %1934 = vmatpush.bf16.msrb.mxu1 %v2840_v2 }
 0x37d   :  { %1947 = vmatpush.bf16.msrb.mxu2 %v2904_v21  ;;  %v1435_v57 = vmul.f32 %v1411_v61, %v3549_v35  ;;  %v1432_v19 = vmul.f32 %v1408_v60, %v3515_v12  ;;  %v1433_v11 = vmul.f32 %v1409_v24, %v3517_v15  ;;  %v1434_v50 = vmul.f32 %v1410_v62, %v3541_v25 }
 0x37e   :  { %v1424_v5 = vrot.slane %v1417_v54, 7  ;;  %v1425_v6 = vrot.slane %v1418_v63, 6  ;;  %v1426_v7 = vrot.slane %v1419_v47, 5 }
 0x380   :  { %v1427_v17 = vsel %vm411_vm11, %v1416_v4, %v1424_v5  ;;  %v1428_v18 = vsel %vm1401_vm12, %v1425_v6, %v1426_v7  ;;  %v3218_v7 = vld [vmem:[#allocation5 + $0x78] sm:$0xff] }
 0x381   :  { %v1429_v38 = vsel %vm1403_vm5, %v1427_v17, %v1428_v18 }
 0x382   :  { %v1431_v40 = vsub.f32 %v1280_v16, %v1429_v38  ;;  %v3226_v16 = vld [vmem:[#allocation5 + $0xb8] sm:$0xff] }
 0x384   :  { %v1440_v55 = vperm.slane %v1431_v40, 3  ;;  %v1437_v3 = vperm.slane %v1431_v40, 0  ;;  %v1438_v22 = vperm.slane %v1431_v40, 1  ;;  %v1439_v39 = vperm.slane %v1431_v40, 2 }
 0x386   :  { %v1448_v26 = vadd.f32 %v1440_v55, %v1435_v57  ;;  %v1445_v27 = vadd.f32 %v1437_v3, %v1432_v19  ;;  %v1446_v29 = vadd.f32 %v1438_v22, %v1433_v11  ;;  %v1447_v30 = vadd.f32 %v1439_v39, %v1434_v50  ;;  %v3217_v11 = vld [vmem:[#allocation5 + $0x70] sm:$0xff] }
 0x387   :  { %v3225_v50 = vld [vmem:[#allocation5 + $0xb0] sm:$0xff] }
 0x388   :  { %vm1449_vm6 = vcmp.gt.f32.partialorder %v1445_v27, 0.0  ;;  %v1453_v31 = vmul.f32 0.2, %v1445_v27  ;;  %vm1450_vm7 = vcmp.gt.f32.partialorder %v1446_v29, 0.0  ;;  %v1454_v32 = vmul.f32 0.2, %v1446_v29 }
 0x389   :  { %vm1451_vm8 = vcmp.gt.f32.partialorder %v1447_v30, 0.0  ;;  %v1455_v35 = vmul.f32 0.2, %v1447_v30  ;;  %vm1452_vm9 = vcmp.gt.f32.partialorder %v1448_v26, 0.0  ;;  %v1456_v12 = vmul.f32 0.2, %v1448_v26 }
 0x38a   :  { %v1457_v9 = vsel %vm1449_vm6, %v1445_v27, %v1453_v31  ;;  %v1458_v15 = vsel %vm1450_vm7, %v1446_v29, %v1454_v32  ;;  %v3216_v29 = vld [vmem:[#allocation5 + $0x68] sm:$0xff] }
 0x38b   :  { %v1525_v33 = vpack.c.bf16 %v1457_v9, %v1457_v9  ;;  %v1526_v25 = vpack.c.bf16 %v1458_v15, %v1458_v15  ;;  %v1459_v34 = vsel %vm1451_vm8, %v1447_v30, %v1455_v35  ;;  %v1460_v36 = vsel %vm1452_vm9, %v1448_v26, %v1456_v12  ;;  %v3224_v30 = vld [vmem:[#allocation5 + $0xa8] sm:$0xff]  ;;  %v3215_v15 = vld [vmem:[#allocation5 + $0x60] sm:$0xff] }
 0x38c   :  { %v1527_v37 = vpack.c.bf16 %v1459_v34, %v1459_v34  ;;  %v1528_v23 = vpack.c.bf16 %v1460_v36, %v1460_v36 }
 0x38d   :  { %1857 = vmatmul.bf16.vlgmr.msrb.gmra.mxu3 %v1525_v33  ;;  %1870 = vmatmul.bf16.vlgmr.msra.gmra.mxu0 %v1526_v25 }
 0x38e   :  { %1883 = vmatmul.bf16.vlgmr.msra.gmra.mxu1 %v1527_v37  ;;  %1896 = vmatmul.bf16.vlgmr.msra.gmra.mxu2 %v1528_v23 }
 0x38f   :  { %2178 = vmatpush.bf16.msrb.mxu3 %v3218_v7  ;;  %2191 = vmatpush.bf16.msra.mxu0 %v3226_v16  ;;  %v1956_v7 = vld [vmem:[#allocation7 + $0x21] ss:$8 sm:$0x3] }
 0x393   :  { %2179 = vmatpush.bf16.msrb.mxu3 %v3217_v11  ;;  %2192 = vmatpush.bf16.msra.mxu0 %v3225_v50 }
 0x397   :  { %2180 = vmatpush.bf16.msrb.mxu3 %v3216_v29  ;;  %2193 = vmatpush.bf16.msra.mxu0 %v3224_v30 }
 0x39b   :  { %2181 = vmatpush.bf16.msrb.mxu3 %v3215_v15 }
 0x39d   :  { %1909 = vmatmul.bf16.vlgmr.msra.gmra.mxu3 %v1525_v33  ;;  %1922 = vmatmul.bf16.vlgmr.msrb.gmra.mxu0 %v1526_v25  ;;  %v3223_v33 = vld [vmem:[#allocation5 + $0xa0] sm:$0xff] }
 0x39e   :  { %1935 = vmatmul.bf16.vlgmr.msrb.gmra.mxu1 %v1527_v37  ;;  %1948 = vmatmul.bf16.vlgmr.msrb.gmra.mxu2 %v1528_v23  ;;  %v3214_v23 = vld [vmem:[#allocation5 + $0x58] sm:$0xff] }
 0x39f   :  { %2194 = vmatpush.bf16.msra.mxu0 %v3223_v33  ;;  %2182 = vmatpush.bf16.msrb.mxu3 %v3214_v23 }
 0x40a   :  { %v1871_v28 = vpop.f32.mrf.mxu0 }
 0x40b   :  { %v1884_v13 = vpop.f32.mrf.mxu1 }
 0x410   :  { %v1858_v10 = vpop.f32.mrf.mxu3 }
 0x411   :  { %v1872_v51 = vadd.f32 %v1871_v28, %v1858_v10  ;;  %v1897_v42 = vpop.f32.mrf.mxu2  ;;  %v3222_v28 = vld [vmem:[#allocation5 + $0x98] sm:$0xff] }
 0x412   :  { %v1873_v43 = vpop.f32.mrf.mxu0  ;;  %2195 = vmatpush.bf16.msra.mxu0 %v3222_v28 }
 0x413   :  { %v1885_v44 = vadd.f32 %v1884_v13, %v1872_v51  ;;  %v1886_v8 = vpop.f32.mrf.mxu1  ;;  %v3213_v43 = vld [vmem:[#allocation5 + $0x50] sm:$0xff] }
 0x414   :  { %2183 = vmatpush.bf16.msrb.mxu3 %v3213_v43 }
 0x415   :  { %v3656_v41 = vadd.f32 %v1897_v42, %v1885_v44  ;;  %v3221_v44 = vld [vmem:[#allocation5 + $0x90] sm:$0xff] }
 0x416   :  { %2196 = vmatpush.bf16.msra.mxu0 %v3221_v44 }
 0x417   :  { %v1957_v45 = vrot.slane %v3656_v41, 4  ;;  %v1971_v46 = vmul.f32 %v3656_v41, %v3656_v41 }
 0x418   :  { %v1860_v48 = vpop.f32.mrf.mxu3 }
 0x419   :  { %v1958_v14 = vadd.f32 %v1957_v45, %v3656_v41  ;;  %v1973_v49 = vrot.slane %v1971_v46, 4  ;;  %v1899_v52 = vpop.f32.mrf.mxu2  ;;  %v3220_v48 = vld [vmem:[#allocation5 + $0x88] sm:$0xff] }
 0x41a   :  { %v1923_v53 = vpop.f32.mrf.mxu0  ;;  %2197 = vmatpush.bf16.msra.mxu0 %v3220_v48  ;;  %v3219_v52 = vld [vmem:[#allocation5 + $0x80] sm:$0xff] }
 0x41b   :  { %v1959_v56 = vrot.slane %v1958_v14, 2  ;;  %v1974_v58 = vadd.f32 %v1973_v49, %v1971_v46  ;;  %v1936_v59 = vpop.f32.mrf.mxu1  ;;  %v3212_v46 = vld [vmem:[#allocation5 + $0x48] sm:$0xff]  ;;  %v3211_v49 = vld [vmem:[#allocation5 + $0x40] sm:$0xff] }
 0x41c   :  { %2184 = vmatpush.bf16.msrb.mxu3 %v3212_v46 }
 0x41d   :  { %v1960_v60 = vadd.f32 %v1959_v56, %v1958_v14  ;;  %v1975_v24 = vrot.slane %v1974_v58, 2 }
 0x41e   :  { %2198 = vmatpush.bf16.msra.mxu0 %v3219_v52 }
 0x41f   :  { %v1961_v62 = vrot.slane %v1960_v60, 1  ;;  %v1976_v61 = vadd.f32 %v1975_v24, %v1974_v58 }
 0x420   :  { %v1910_v0 = vpop.f32.mrf.mxu3  ;;  %2185 = vmatpush.bf16.msrb.mxu3 %v3211_v49 }
 0x421   :  { %v1962_v1 = vadd.f32 %v1961_v62, %v1960_v60  ;;  %v1977_v2 = vrot.slane %v1976_v61, 1  ;;  %v1924_v54 = vadd.f32 %v1923_v53, %v1910_v0  ;;  %v1949_v63 = vpop.f32.mrf.mxu2 }
 0x422   :  { %v1925_v47 = vpop.f32.mrf.mxu0 }
 0x423   :  { %v3663_v21 = vmul.f32 %v1962_v1, %v3422_v20  ;;  %v1978_v4 = vadd.f32 %v1977_v2, %v1976_v61  ;;  %v1937_v5 = vadd.f32 %v1936_v59, %v1924_v54  ;;  %v1938_v6 = vpop.f32.mrf.mxu1  ;;  %v1954_v1 = vld [vmem:[#allocation7 + $0x4] ss:$8 sm:$0x3] }
 0x425   :  { %v1985_v17 = vmul.f32 %v1978_v4, %v3422_v20  ;;  %v1987_v18 = vmul.f32 %v3663_v21, %v3663_v21  ;;  %v3668_v38 = vadd.f32 %v1949_v63, %v1937_v5 }
 0x427   :  { %v1963_v40 = vrot.slane %v3668_v38, 4  ;;  %v1972_v57 = vmul.f32 %v3668_v38, %v3668_v38  ;;  %v1989_v55 = vsub.f32 %v1985_v17, %v1987_v18 }
 0x428   :  { %v1912_v19 = vpop.f32.mrf.mxu3 }
 0x429   :  { %v1964_v3 = vadd.f32 %v1963_v40, %v3668_v38  ;;  %v1979_v22 = vrot.slane %v1972_v57, 4  ;;  %v1951_v39 = vpop.f32.mrf.mxu2  ;;  %v1991_v31 = vadd.f32 0.8, %v1989_v55 }
 0x42b   :  { %v1965_v26 = vrot.slane %v1964_v3, 2  ;;  %v1980_v27 = vadd.f32 %v1979_v22, %v1972_v57  ;;  %3256 = vrsqrt.f32 %v1991_v31  ;;  %vm1999_vm15 = vweird.f32 %v1991_v31 }
 0x42d   :  { %v1966_v32 = vadd.f32 %v1965_v26, %v1964_v3  ;;  %v1981_v35 = vrot.slane %v1980_v27, 2 }
 0x42f   :  { %v1967_v12 = vrot.slane %v1966_v32, 1  ;;  %v1982_v9 = vadd.f32 %v1981_v35, %v1980_v27 }
 0x431   :  { %v1968_v25 = vadd.f32 %v1967_v12, %v1966_v32  ;;  %v1983_v34 = vrot.slane %v1982_v9, 1  ;;  %v3257_v51 = vpop.eup %3256 }
 0x432   :  { %v1994_v45 = vmul.f32 %v3257_v51, %v1991_v31  ;;  %vm2000_vm12 = vweird.f32 %v3257_v51  ;;  %v2081_v31 = vld [vmem:[#allocation7 + $0x22] ss:$0 sm:$0xff] }
 0x433   :  { %v1970_v36 = vmul.f32 %v1968_v25, %v3422_v20  ;;  %v1984_v37 = vadd.f32 %v1983_v34, %v1982_v9  ;;  %vm2001_vm0 = vmor %vm1999_vm15, %vm2000_vm12 }
 0x434   :  { %v1995_v14 = vmul.f32 %v3257_v51, %v1994_v45 }
 0x435   :  { %v1986_v13 = vmul.f32 %v1984_v37, %v3422_v20  ;;  %v1988_v10 = vmul.f32 %v1970_v36, %v1970_v36 }
 0x436   :  { %v1996_v53 = vmul.f32 0.5, %v1995_v14 }
 0x437   :  { %v1990_v42 = vsub.f32 %v1986_v13, %v1988_v10 }
 0x438   :  { %v1997_v59 = vsub.f32 1.5, %v1996_v53 }
 0x439   :  { %v1992_v8 = vadd.f32 0.8, %v1990_v42 }
 0x43a   :  { %v1998_v62 = vmul.f32 %v3257_v51, %v1997_v59 }
 0x43b   :  { %3258 = vrsqrt.f32 %v1992_v8  ;;  %vm2009_vm13 = vweird.f32 %v1992_v8 }
 0x43c   :  { %v2002_v54 = vsel %vm2001_vm0, %v3257_v51, %v1998_v62 }
 0x441   :  { %v3259_v20 = vpop.eup %3258 }
 0x442   :  { %v2004_v56 = vmul.f32 %v3259_v20, %v1992_v8  ;;  %vm2010_vm10 = vweird.f32 %v3259_v20 }
 0x443   :  { %vm2011_vm14 = vmor %vm2009_vm13, %vm2010_vm10 }
 0x444   :  { %v2005_v58 = vmul.f32 %v3259_v20, %v2004_v56 }
 0x446   :  { %v2006_v60 = vmul.f32 0.5, %v2005_v58 }
 0x448   :  { %v2007_v24 = vsub.f32 1.5, %v2006_v60 }
 0x44a   :  { %v2008_v61 = vmul.f32 %v3259_v20, %v2007_v24 }
 0x44c   :  { %v2012_v0 = vsel %vm2011_vm14, %v3259_v20, %v2008_v61 }
 0x44d   :  { %v2015_v2 = vrot.slane %v2012_v0, 7 }
 0x44f   :  { %v2016_v63 = vsel %vm411_vm11, %v2002_v54, %v2015_v2 }
 0x450   :  { %v2018_v47 = vmul.f32 %v2016_v63, %v1954_v1 }
 0x452   :  { %v2020_v4 = vperm.slane %v2018_v47, 0  ;;  %v2021_v5 = vperm.slane %v2018_v47, 1 }
 0x454   :  { %v2025_v6 = vmul.f32 %v2021_v5, %v1970_v36  ;;  %v2024_v16 = vmul.f32 %v2020_v4, %v3663_v21  ;;  %v2033_v57 = vmul.f32 %v2021_v5, %v3668_v38  ;;  %v2032_v11 = vmul.f32 %v2020_v4, %v3656_v41 }
 0x456   :  { %v2028_v17 = vrot.slane %v2025_v6, 7 }
 0x458   :  { %v2029_v18 = vsel %vm411_vm11, %v2024_v16, %v2028_v17 }
 0x459   :  { %v2031_v40 = vsub.f32 %v1956_v7, %v2029_v18 }
 0x45b   :  { %v2036_v19 = vperm.slane %v2031_v40, 1  ;;  %v2035_v50 = vperm.slane %v2031_v40, 0 }
 0x45d   :  { %v2040_v55 = vadd.f32 %v2036_v19, %v2033_v57  ;;  %v2039_v3 = vadd.f32 %v2035_v50, %v2032_v11 }
 0x45f   :  { %vm2041_vm1 = vcmp.gt.f32.partialorder %v2039_v3, 0.0  ;;  %v2043_v22 = vmul.f32 0.2, %v2039_v3  ;;  %vm2042_vm2 = vcmp.gt.f32.partialorder %v2040_v55, 0.0  ;;  %v2044_v39 = vmul.f32 0.2, %v2040_v55 }
 0x461   :  { %v2045_v26 = vsel %vm2041_vm1, %v2039_v3, %v2043_v22  ;;  %v2046_v27 = vsel %vm2042_vm2, %v2040_v55, %v2044_v39 }
 0x462   :  { %v2079_v29 = vpack.c.bf16 %v2045_v26, %v2045_v26  ;;  %v2080_v21 = vpack.c.bf16 %v2046_v27, %v2046_v27 }
 0x464   :  { %2186 = vmatmul.bf16.vlgmr.msrb.gmra.mxu3 %v2079_v29  ;;  %2199 = vmatmul.bf16.vlgmr.msra.gmra.mxu0 %v2080_v21 }
 0x4e1   :  { %v2200_v30 = vpop.f32.mrf.mxu0 }
 0x4e7   :  { %v2187_v32 = vpop.f32.mrf.mxu3 }
 0x4e8   :  { %v2188_v38 = vadd.f32 %v2187_v32, %v2081_v31 }
 0x4e9   :  { %v2202_v35 = vpop.f32.mrf.mxu0 }
 0x4ea   :  { %v2201_v12 = vadd.f32 %v2200_v30, %v2188_v38 }
 0x4ec   :  { %3260 = vtanh.f32 %v2201_v12 }
 0x4ef   :  { %v2189_v41 = vpop.f32.mrf.mxu3 }
 0x4f2   :  { %v3261_v9 = vpop.eup %3260 }
 0x4f3   :  { %2205 = vst [vmem:[%s3690_s6] sm:$0xff] %v3261_v9 }
 0x4f4   :  { %2210 = vsyncpa [#allocation6], 1 }
 0x4f5   :  { %2211 = vsyncpa [#allocation8], 1 }
 0x4f6   :  { %2212 = vsyncmov [#allocation4] }
 0x4f9   :  { %s2213_s23 = vpop.sfrf %2212 }
 0x4fa   :  { %p3025_p0 = scmp.ne.s32.totalorder %s2213_s23, 0 }
 0x4fc   :  { %2217 = shalt.err (%p3025_p0)  }
 0x4fd   :  { %2219 = vsyncmov [#allocation4 + $0x1] }
 0x500   :  { %s2220_s24 = vpop.sfrf %2219 }
 0x501   :  { %p3026_p1 = scmp.ne.s32.totalorder %s2220_s24, 0 }
 0x503   :  { %2224 = shalt.err (%p3026_p1)  }

</bundles_post_ra>
